<compile_context>
chip_gen: v7x
topology: tpu7x:2x2x1
jax: 0.10.0
libtpu: 0.0.40
codegen_flags: <defaults>
</compile_context>

<pallas_src>
import functools

import jax
import jax.numpy as jnp
from jax import lax
from jax.experimental import pallas as pl
from jax.experimental.pallas import tpu as pltpu


def _sigmoid_exact(x):
    return 1.0 / (1.0 + jnp.exp(-x))


def _sigmoid_fast(x):
    # exp on the EUP, reciprocal on the EUP vrcp slot (approx) -> no f32 divide
    # on the recurrent critical path.
    return pl.reciprocal(1.0 + jnp.exp(-x), approx=True)


# ----------------------------------------------------------------------------
# Fused decoder kernel.  One grid step = one batch tile; the whole sequence is
# processed by an in-kernel fori_loop over time.
#
# ref order: x_ref, (W_fused, bias) * L, w_lin, b_lin, out_ref
#   x_ref   : [S, tb, E]  bf16 (dropout-masked embeddings, features prepended)
#   W_fused : [(E or H)+H, 4H] bf16   (VMEM resident, constant index_map)
#   bias    : [1, 4H] f32             (b_ih + b_hh)
#   w_lin   : [H, V] bf16, b_lin: [1, V] f32
#   out_ref : [S, tb, V] f32
# ----------------------------------------------------------------------------
def _decoder_kernel(num_layers, hidden, x_ref, *args):
    n_w = 2 * num_layers + 2
    w_refs = args[:n_w]
    out_ref = args[n_w]

    seq_len = x_ref.shape[0]
    tb = x_ref.shape[1]

    # Hoist resident weight loads + bias broadcasts out of the time loop.
    Ws = [w_refs[2 * l][...] for l in range(num_layers)]               # bf16
    bs = [jnp.broadcast_to(w_refs[2 * l + 1][...], (tb, 4 * hidden))   # f32
          for l in range(num_layers)]
    w_lin = w_refs[2 * num_layers][...]                                # bf16
    b_lin = jnp.broadcast_to(w_refs[2 * num_layers + 1][...],
                             (tb, w_lin.shape[1]))                     # f32

    h0 = tuple(jnp.zeros((tb, hidden), jnp.bfloat16) for _ in range(num_layers))
    c0 = tuple(jnp.zeros((tb, hidden), jnp.float32) for _ in range(num_layers))

    def step(t, carry):
        hs, cs = carry
        x = x_ref[t]                                        # [tb, E] bf16
        new_hs, new_cs = [], []
        for l in range(num_layers):                         # static -> unrolled
            xh = jnp.concatenate([x, hs[l]], axis=-1)       # [tb, E+H] bf16
            gates = jnp.dot(xh, Ws[l],
                            preferred_element_type=jnp.float32) + bs[l]
            i = _sigmoid_fast(gates[:, 0 * hidden:1 * hidden])
            f = _sigmoid_fast(gates[:, 1 * hidden:2 * hidden])
            g = jnp.tanh(gates[:, 2 * hidden:3 * hidden])
            o = _sigmoid_fast(gates[:, 3 * hidden:4 * hidden])
            c = f * cs[l] + i * g                           # f32
            h = (o * jnp.tanh(c)).astype(jnp.bfloat16)      # bf16 once, reused
            new_hs.append(h)
            new_cs.append(c)
            x = h                                           # feeds next layer
        # Fused Linear head (lane-dense V -> unmasked stores).
        logits = jnp.dot(x, w_lin, preferred_element_type=jnp.float32) + b_lin
        out_ref[t] = logits.astype(out_ref.dtype)
        return tuple(new_hs), tuple(new_cs)

    lax.fori_loop(0, seq_len, step, (h0, c0))


# ----------------------------------------------------------------------------
# Wrapper glue: embedding gather + Dropout(0.5) + prepend features.
# ----------------------------------------------------------------------------
def _embed_dropout_concat(features, captions, emb_table, dropout_key, training):
    emb = jnp.take(emb_table, captions, axis=0)                   # [T, B, E]
    if training:
        keep = jax.random.bernoulli(dropout_key, 0.5, emb.shape)
        emb = jnp.where(keep, emb * 2.0, jnp.zeros_like(emb))
    return jnp.concatenate([features[None, :, :], emb], axis=0)   # [T+1, B, E]


@functools.partial(jax.jit, static_argnames=("batch_tile", "training"))
def decoder_rnn_forward(features, captions, params, dropout_key,
                        *, batch_tile=256, training=True):
    """features: [B, E] f32; captions: [T, B] int32 -> logits [T+1, B, V] f32."""
    emb_table = params["embedding"]
    lstm_layers = params["lstm"]
    w_lin, b_lin = params["linear_w"], params["linear_b"]
    num_layers = len(lstm_layers)

    T, B = captions.shape
    E = emb_table.shape[1]
    H = w_lin.shape[0]
    V = w_lin.shape[1]
    S = T + 1

    tb = min(batch_tile, B)
    assert B % tb == 0, "batch must be divisible by the batch tile"

    x_seq = _embed_dropout_concat(features, captions, emb_table, dropout_key,
                                  training)
    x_seq = x_seq.astype(jnp.bfloat16)            # halve the streamed HBM bytes

    operands = [x_seq]
    in_specs = [pl.BlockSpec((S, tb, E), lambda b: (0, b, 0))]
    for (w_ih, w_hh, bias) in lstm_layers:
        w_fused = jnp.concatenate([w_ih, w_hh], axis=0).astype(jnp.bfloat16)
        operands += [w_fused, bias]
        in_specs += [
            pl.BlockSpec(w_fused.shape, lambda b: (0, 0)),   # VMEM resident
            pl.BlockSpec(bias.shape, lambda b: (0, 0)),      # VMEM resident
        ]
    operands += [w_lin.astype(jnp.bfloat16), b_lin]
    in_specs += [
        pl.BlockSpec(w_lin.shape, lambda b: (0, 0)),         # VMEM resident
        pl.BlockSpec(b_lin.shape, lambda b: (0, 0)),         # VMEM resident
    ]

    kernel = functools.partial(_decoder_kernel, num_layers, H)

    # TODO(synk): for production vocab sizes (e.g. 32K) emit bf16 logits or
    # tile V in the output BlockSpec so the slab fits v7x's 64 MiB VMEM.
    return pl.pallas_call(
        kernel,
        out_shape=jax.ShapeDtypeStruct((S, B, V), jnp.float32),
        grid_spec=pltpu.PrefetchScalarGridSpec(
            num_scalar_prefetch=0,
            grid=(B // tb,),
            in_specs=in_specs,
            out_specs=pl.BlockSpec((S, tb, V), lambda b: (0, b, 0)),
        ),
        compiler_params=pltpu.CompilerParams(
            dimension_semantics=("parallel",)),
    )(*operands)


# ----------------------------------------------------------------------------
# Pure-JAX reference (same fused-W / bf16-operand recipe, exact sigmoid).
# ----------------------------------------------------------------------------
def decoder_rnn_reference(features, captions, params, dropout_key,
                          training=True):
    x_seq = _embed_dropout_concat(features, captions, params["embedding"],
                                  dropout_key, training)
    S, B, _ = x_seq.shape
    H = params["linear_w"].shape[0]
    x = x_seq.astype(jnp.bfloat16)
    for (w_ih, w_hh, bias) in params["lstm"]:
        W = jnp.concatenate([w_ih, w_hh], axis=0).astype(jnp.bfloat16)
        h = jnp.zeros((B, H), jnp.bfloat16)
        c = jnp.zeros((B, H), jnp.float32)
        hs = []
        for t in range(S):
            xh = jnp.concatenate([x[t], h], axis=-1)
            gates = jnp.dot(xh, W, preferred_element_type=jnp.float32) + bias
            i = _sigmoid_exact(gates[:, 0 * H:1 * H])
            f = _sigmoid_exact(gates[:, 1 * H:2 * H])
            g = jnp.tanh(gates[:, 2 * H:3 * H])
            o = _sigmoid_exact(gates[:, 3 * H:4 * H])
            c = f * c + i * g
            h = (o * jnp.tanh(c)).astype(jnp.bfloat16)
            hs.append(h)
        x = jnp.stack(hs, axis=0)
    logits = (jnp.dot(x.reshape(S * B, H),
                      params["linear_w"].astype(jnp.bfloat16),
                      preferred_element_type=jnp.float32)
              + params["linear_b"]).reshape(S, B, -1)
    return logits


def init_params(key, embed_size, hidden_size, vocab_size, num_layers):
    """Deterministic synthetic parameters in the layouts the kernel consumes."""
    k_emb, k_lw, k_lb, k_lstm = jax.random.split(key, 4)
    emb_table = 0.1 * jax.random.normal(
        k_emb, (vocab_size, embed_size), jnp.float32)
    layer_keys = jax.random.split(k_lstm, num_layers)
    lstm = []
    for l in range(num_layers):
        in_dim = embed_size if l == 0 else hidden_size
        k1, k2, k3 = jax.random.split(layer_keys[l], 3)
        w_ih = 0.1 * jax.random.normal(k1, (in_dim, 4 * hidden_size), jnp.float32)
        w_hh = 0.1 * jax.random.normal(k2, (hidden_size, 4 * hidden_size), jnp.float32)
        bias = 0.01 * jax.random.normal(k3, (1, 4 * hidden_size), jnp.float32)
        lstm.append((w_ih, w_hh, bias))                    # gate order i, f, g, o
    linear_w = 0.1 * jax.random.normal(k_lw, (hidden_size, vocab_size), jnp.float32)
    linear_b = 0.01 * jax.random.normal(k_lb, (1, vocab_size), jnp.float32)
    return {"embedding": emb_table, "lstm": tuple(lstm),
            "linear_w": linear_w, "linear_b": linear_b}


if __name__ == "__main__":
    key = jax.random.PRNGKey(0)
    embed_size, hidden_size, vocab_size, num_layers = 128, 128, 256, 2
    T, B = 8, 16                                  # caption length, batch

    k_feat, k_cap, k_par, k_drop = jax.random.split(key, 4)
    features = jax.random.normal(k_feat, (B, embed_size), jnp.float32)
    captions = jax.random.randint(k_cap, (T, B), 0, vocab_size, dtype=jnp.int32)
    params = init_params(k_par, embed_size, hidden_size, vocab_size, num_layers)

    # batch_tile=8 -> 2 batch tiles so the "parallel" grid axis has work for
    # both v7x TensorCores even at this toy batch size.
    out = decoder_rnn_forward(features, captions, params, k_drop, batch_tile=8)
    out = jax.block_until_ready(out)
    assert out.shape == (T + 1, B, vocab_size) and out.dtype == jnp.float32
    assert bool(jnp.all(jnp.isfinite(out)))

    ref = decoder_rnn_reference(features, captions, params, k_drop)
    # Tolerance covers the in-kernel approx-EUP reciprocal + bf16 operands.
    assert bool(jnp.allclose(out, ref, atol=2e-2, rtol=2e-2))
    print("KERNEL_OK")
</pallas_src>

<mosaic_0001>
module attributes {stable_mosaic.version = 11 : i64} {
  func.func @_decoder_kernel(%arg0: i32, %arg1: memref<9x8x128xbf16, #tpu.memory_space<vmem>>, %arg2: memref<256x512xbf16, #tpu.memory_space<vmem>>, %arg3: memref<1x512xf32, #tpu.memory_space<vmem>>, %arg4: memref<256x512xbf16, #tpu.memory_space<vmem>>, %arg5: memref<1x512xf32, #tpu.memory_space<vmem>>, %arg6: memref<128x256xbf16, #tpu.memory_space<vmem>>, %arg7: memref<1x256xf32, #tpu.memory_space<vmem>>, %arg8: memref<9x8x256xf32, #tpu.memory_space<vmem>>) attributes {dimension_semantics = [#tpu.dimension_semantics<parallel>], iteration_bounds = array<i64: 2>, scalar_prefetch = 0 : i64, scratch_operands = 0 : i64, tpu.core_type = #tpu.core_type<tc>, window_params = [{transform_indices = @transform_0, window_bounds = array<i64: 9, 8, 128>}, {pipeline_mode = #tpu.pipeline_mode<synchronous>, transform_indices = @transform_1, window_bounds = array<i64: 256, 512>}, {pipeline_mode = #tpu.pipeline_mode<synchronous>, transform_indices = @transform_2, window_bounds = array<i64: 1, 512>}, {pipeline_mode = #tpu.pipeline_mode<synchronous>, transform_indices = @transform_3, window_bounds = array<i64: 256, 512>}, {pipeline_mode = #tpu.pipeline_mode<synchronous>, transform_indices = @transform_4, window_bounds = array<i64: 1, 512>}, {pipeline_mode = #tpu.pipeline_mode<synchronous>, transform_indices = @transform_5, window_bounds = array<i64: 128, 256>}, {pipeline_mode = #tpu.pipeline_mode<synchronous>, transform_indices = @transform_6, window_bounds = array<i64: 1, 256>}, {transform_indices = @transform_7, window_bounds = array<i64: 9, 8, 256>}]} {
    %c0 = arith.constant 0 : index
    %c0_0 = arith.constant 0 : index
    %0 = vector.load %arg2[%c0, %c0_0] : memref<256x512xbf16, #tpu.memory_space<vmem>>, vector<256x512xbf16>
    %c0_1 = arith.constant 0 : index
    %c0_2 = arith.constant 0 : index
    %1 = vector.load %arg4[%c0_1, %c0_2] : memref<256x512xbf16, #tpu.memory_space<vmem>>, vector<256x512xbf16>
    %c0_3 = arith.constant 0 : index
    %c0_4 = arith.constant 0 : index
    %2 = vector.load %arg3[%c0_3, %c0_4] : memref<1x512xf32, #tpu.memory_space<vmem>>, vector<1x512xf32>
    %3 = vector.shape_cast %2 : vector<1x512xf32> to vector<1x512xf32>
    %4 = vector.broadcast %3 : vector<1x512xf32> to vector<8x512xf32>
    %c0_5 = arith.constant 0 : index
    %c0_6 = arith.constant 0 : index
    %5 = vector.load %arg5[%c0_5, %c0_6] : memref<1x512xf32, #tpu.memory_space<vmem>>, vector<1x512xf32>
    %6 = vector.shape_cast %5 : vector<1x512xf32> to vector<1x512xf32>
    %7 = vector.broadcast %6 : vector<1x512xf32> to vector<8x512xf32>
    %c0_7 = arith.constant 0 : index
    %c0_8 = arith.constant 0 : index
    %8 = vector.load %arg6[%c0_7, %c0_8] : memref<128x256xbf16, #tpu.memory_space<vmem>>, vector<128x256xbf16>
    %c0_9 = arith.constant 0 : index
    %c0_10 = arith.constant 0 : index
    %9 = vector.load %arg7[%c0_9, %c0_10] : memref<1x256xf32, #tpu.memory_space<vmem>>, vector<1x256xf32>
    %10 = vector.shape_cast %9 : vector<1x256xf32> to vector<1x256xf32>
    %11 = vector.broadcast %10 : vector<1x256xf32> to vector<8x256xf32>
    %cst = arith.constant 0.000000e+00 : bf16
    %12 = vector.broadcast %cst : bf16 to vector<8x128xbf16>
    %cst_11 = arith.constant 0.000000e+00 : bf16
    %13 = vector.broadcast %cst_11 : bf16 to vector<8x128xbf16>
    %cst_12 = arith.constant 0.000000e+00 : f32
    %14 = vector.broadcast %cst_12 : f32 to vector<8x128xf32>
    %cst_13 = arith.constant 0.000000e+00 : f32
    %15 = vector.broadcast %cst_13 : f32 to vector<8x128xf32>
    %c0_i32 = arith.constant 0 : i32
    %c9_i32 = arith.constant 9 : i32
    %16 = arith.addi %c0_i32, %c9_i32 : i32
    %c1_i32 = arith.constant 1 : i32
    %17:4 = scf.for %arg9 = %c0_i32 to %16 step %c1_i32 iter_args(%arg10 = %12, %arg11 = %13, %arg12 = %14, %arg13 = %15) -> (vector<8x128xbf16>, vector<8x128xbf16>, vector<8x128xf32>, vector<8x128xf32>)  : i32 {
      %18 = arith.index_cast %arg9 : i32 to index
      %c0_15 = arith.constant 0 : index
      %c0_16 = arith.constant 0 : index
      %19 = vector.load %arg1[%18, %c0_15, %c0_16] : memref<9x8x128xbf16, #tpu.memory_space<vmem>>, vector<1x8x128xbf16>
      %20 = vector.shape_cast %19 : vector<1x8x128xbf16> to vector<8x128xbf16>
      %21 = tpu.concatenate %20, %arg10 in 1 : vector<8x128xbf16>, vector<8x128xbf16> -> vector<8x256xbf16>
      %cst_17 = arith.constant dense<0.000000e+00> : vector<8x512xf32>
      %22 = tpu.matmul %21, %0, %cst_17 {dimension_numbers = #tpu.dot_dimension_numbers<[1], [0], [0], [1], [0, 0, 1, 1], [], []>} : vector<8x256xbf16>, vector<256x512xbf16>, vector<8x512xf32> -> vector<8x512xf32>
      %23 = arith.addf %22, %4 : vector<8x512xf32>
      %24 = vector.extract_strided_slice %23 {offsets = [0, 0], sizes = [8, 128], strides = [1, 1]} : vector<8x512xf32> to vector<8x128xf32>
      %cst_18 = arith.constant 0.000000e+00 : f32
      %25 = vector.broadcast %cst_18 : f32 to vector<8x128xf32>
      %26 = arith.subf %25, %24 : vector<8x128xf32>
      %27 = math.exp %26 : vector<8x128xf32>
      %cst_19 = arith.constant 1.000000e+00 : f32
      %28 = vector.broadcast %cst_19 : f32 to vector<8x128xf32>
      %29 = arith.addf %28, %27 : vector<8x128xf32>
      %30 = tpu.reciprocal %29 {approx = true} : vector<8x128xf32> -> vector<8x128xf32>
      %31 = vector.extract_strided_slice %23 {offsets = [0, 128], sizes = [8, 128], strides = [1, 1]} : vector<8x512xf32> to vector<8x128xf32>
      %cst_20 = arith.constant 0.000000e+00 : f32
      %32 = vector.broadcast %cst_20 : f32 to vector<8x128xf32>
      %33 = arith.subf %32, %31 : vector<8x128xf32>
      %34 = math.exp %33 : vector<8x128xf32>
      %cst_21 = arith.constant 1.000000e+00 : f32
      %35 = vector.broadcast %cst_21 : f32 to vector<8x128xf32>
      %36 = arith.addf %35, %34 : vector<8x128xf32>
      %37 = tpu.reciprocal %36 {approx = true} : vector<8x128xf32> -> vector<8x128xf32>
      %38 = vector.extract_strided_slice %23 {offsets = [0, 256], sizes = [8, 128], strides = [1, 1]} : vector<8x512xf32> to vector<8x128xf32>
      %39 = math.tanh %38 : vector<8x128xf32>
      %40 = vector.extract_strided_slice %23 {offsets = [0, 384], sizes = [8, 128], strides = [1, 1]} : vector<8x512xf32> to vector<8x128xf32>
      %cst_22 = arith.constant 0.000000e+00 : f32
      %41 = vector.broadcast %cst_22 : f32 to vector<8x128xf32>
      %42 = arith.subf %41, %40 : vector<8x128xf32>
      %43 = math.exp %42 : vector<8x128xf32>
      %cst_23 = arith.constant 1.000000e+00 : f32
      %44 = vector.broadcast %cst_23 : f32 to vector<8x128xf32>
      %45 = arith.addf %44, %43 : vector<8x128xf32>
      %46 = tpu.reciprocal %45 {approx = true} : vector<8x128xf32> -> vector<8x128xf32>
      %47 = arith.mulf %37, %arg12 : vector<8x128xf32>
      %48 = arith.mulf %30, %39 : vector<8x128xf32>
      %49 = arith.addf %47, %48 : vector<8x128xf32>
      %50 = math.tanh %49 : vector<8x128xf32>
      %51 = arith.mulf %46, %50 : vector<8x128xf32>
      %52 = arith.truncf %51 : vector<8x128xf32> to vector<8x128xbf16>
      %53 = tpu.concatenate %52, %arg11 in 1 : vector<8x128xbf16>, vector<8x128xbf16> -> vector<8x256xbf16>
      %cst_24 = arith.constant dense<0.000000e+00> : vector<8x512xf32>
      %54 = tpu.matmul %53, %1, %cst_24 {dimension_numbers = #tpu.dot_dimension_numbers<[1], [0], [0], [1], [0, 0, 1, 1], [], []>} : vector<8x256xbf16>, vector<256x512xbf16>, vector<8x512xf32> -> vector<8x512xf32>
      %55 = arith.addf %54, %7 : vector<8x512xf32>
      %56 = vector.extract_strided_slice %55 {offsets = [0, 0], sizes = [8, 128], strides = [1, 1]} : vector<8x512xf32> to vector<8x128xf32>
      %cst_25 = arith.constant 0.000000e+00 : f32
      %57 = vector.broadcast %cst_25 : f32 to vector<8x128xf32>
      %58 = arith.subf %57, %56 : vector<8x128xf32>
      %59 = math.exp %58 : vector<8x128xf32>
      %cst_26 = arith.constant 1.000000e+00 : f32
      %60 = vector.broadcast %cst_26 : f32 to vector<8x128xf32>
      %61 = arith.addf %60, %59 : vector<8x128xf32>
      %62 = tpu.reciprocal %61 {approx = true} : vector<8x128xf32> -> vector<8x128xf32>
      %63 = vector.extract_strided_slice %55 {offsets = [0, 128], sizes = [8, 128], strides = [1, 1]} : vector<8x512xf32> to vector<8x128xf32>
      %cst_27 = arith.constant 0.000000e+00 : f32
      %64 = vector.broadcast %cst_27 : f32 to vector<8x128xf32>
      %65 = arith.subf %64, %63 : vector<8x128xf32>
      %66 = math.exp %65 : vector<8x128xf32>
      %cst_28 = arith.constant 1.000000e+00 : f32
      %67 = vector.broadcast %cst_28 : f32 to vector<8x128xf32>
      %68 = arith.addf %67, %66 : vector<8x128xf32>
      %69 = tpu.reciprocal %68 {approx = true} : vector<8x128xf32> -> vector<8x128xf32>
      %70 = vector.extract_strided_slice %55 {offsets = [0, 256], sizes = [8, 128], strides = [1, 1]} : vector<8x512xf32> to vector<8x128xf32>
      %71 = math.tanh %70 : vector<8x128xf32>
      %72 = vector.extract_strided_slice %55 {offsets = [0, 384], sizes = [8, 128], strides = [1, 1]} : vector<8x512xf32> to vector<8x128xf32>
      %cst_29 = arith.constant 0.000000e+00 : f32
      %73 = vector.broadcast %cst_29 : f32 to vector<8x128xf32>
      %74 = arith.subf %73, %72 : vector<8x128xf32>
      %75 = math.exp %74 : vector<8x128xf32>
      %cst_30 = arith.constant 1.000000e+00 : f32
      %76 = vector.broadcast %cst_30 : f32 to vector<8x128xf32>
      %77 = arith.addf %76, %75 : vector<8x128xf32>
      %78 = tpu.reciprocal %77 {approx = true} : vector<8x128xf32> -> vector<8x128xf32>
      %79 = arith.mulf %69, %arg13 : vector<8x128xf32>
      %80 = arith.mulf %62, %71 : vector<8x128xf32>
      %81 = arith.addf %79, %80 : vector<8x128xf32>
      %82 = math.tanh %81 : vector<8x128xf32>
      %83 = arith.mulf %78, %82 : vector<8x128xf32>
      %84 = arith.truncf %83 : vector<8x128xf32> to vector<8x128xbf16>
      %cst_31 = arith.constant dense<0.000000e+00> : vector<8x256xf32>
      %85 = tpu.matmul %84, %8, %cst_31 {dimension_numbers = #tpu.dot_dimension_numbers<[1], [0], [0], [1], [0, 0, 1, 1], [], []>} : vector<8x128xbf16>, vector<128x256xbf16>, vector<8x256xf32> -> vector<8x256xf32>
      %86 = arith.addf %85, %11 : vector<8x256xf32>
      %87 = arith.index_cast %arg9 : i32 to index
      %c0_32 = arith.constant 0 : index
      %c0_33 = arith.constant 0 : index
      %88 = vector.load %arg8[%87, %c0_32, %c0_33] : memref<9x8x256xf32, #tpu.memory_space<vmem>>, vector<1x8x256xf32>
      %89 = vector.shape_cast %88 : vector<1x8x256xf32> to vector<8x256xf32>
      %90 = vector.shape_cast %86 : vector<8x256xf32> to vector<1x8x256xf32>
      tpu.vector_store %arg8[%87, %c0_32, %c0_33], %90 {strides = array<i32>} : memref<9x8x256xf32, #tpu.memory_space<vmem>>, vector<1x8x256xf32>,
      scf.yield %52, %84, %49, %81 : vector<8x128xbf16>, vector<8x128xbf16>, vector<8x128xf32>, vector<8x128xf32>
    }
    %c9_i32_14 = arith.constant 9 : i32
    return
  }
  func.func @transform_0(%arg0: i32) -> (i32, i32, i32) {
    %c0_i32 = arith.constant 0 : i32
    %c0_i32_0 = arith.constant 0 : i32
    %c0_i32_1 = arith.constant 0 : i32
    return %c0_i32, %arg0, %c0_i32_0 : i32, i32, i32
  }
  func.func @transform_1(%arg0: i32) -> (i32, i32) {
    %c0_i32 = arith.constant 0 : i32
    %c0_i32_0 = arith.constant 0 : i32
    %c0_i32_1 = arith.constant 0 : i32
    return %c0_i32, %c0_i32_0 : i32, i32
  }
  func.func @transform_2(%arg0: i32) -> (i32, i32) {
    %c0_i32 = arith.constant 0 : i32
    %c0_i32_0 = arith.constant 0 : i32
    %c0_i32_1 = arith.constant 0 : i32
    return %c0_i32, %c0_i32_0 : i32, i32
  }
  func.func @transform_3(%arg0: i32) -> (i32, i32) {
    %c0_i32 = arith.constant 0 : i32
    %c0_i32_0 = arith.constant 0 : i32
    %c0_i32_1 = arith.constant 0 : i32
    return %c0_i32, %c0_i32_0 : i32, i32
  }
  func.func @transform_4(%arg0: i32) -> (i32, i32) {
    %c0_i32 = arith.constant 0 : i32
    %c0_i32_0 = arith.constant 0 : i32
    %c0_i32_1 = arith.constant 0 : i32
    return %c0_i32, %c0_i32_0 : i32, i32
  }
  func.func @transform_5(%arg0: i32) -> (i32, i32) {
    %c0_i32 = arith.constant 0 : i32
    %c0_i32_0 = arith.constant 0 : i32
    %c0_i32_1 = arith.constant 0 : i32
    return %c0_i32, %c0_i32_0 : i32, i32
  }
  func.func @transform_6(%arg0: i32) -> (i32, i32) {
    %c0_i32 = arith.constant 0 : i32
    %c0_i32_0 = arith.constant 0 : i32
    %c0_i32_1 = arith.constant 0 : i32
    return %c0_i32, %c0_i32_0 : i32, i32
  }
  func.func @transform_7(%arg0: i32) -> (i32, i32, i32) {
    %c0_i32 = arith.constant 0 : i32
    %c0_i32_0 = arith.constant 0 : i32
    %c0_i32_1 = arith.constant 0 : i32
    return %c0_i32, %arg0, %c0_i32_0 : i32, i32, i32
  }
}

</mosaic_0001>

<bundles_post_ra>
// kernel: decoder_rnn_forward.1
= control target key start
LH: loop header
LB: loop body
LE: loop exit
PB: predicated region body
PF: predicated region fallthrough
CT: control target
= control target key end

     0   :  { %12 = vsyncpa [#allocation4], 0  ;;  %s3311_s0 = inlined_call_operand.vmem [shape: bf16[9,16,128], index: 0, kind: input, shape index: {}]   ;;  %s3312_s1 = inlined_call_operand.vmem [shape: bf16[256,512], index: 1, kind: input, shape index: {}]   ;;  %s3313_s2 = inlined_call_operand.vmem [shape: f32[1,512], index: 2, kind: input, shape index: {}]   ;;  %s3314_s3 = inlined_call_operand.vmem [shape: bf16[256,512], index: 3, kind: input, shape index: {}]   ;;  %s3315_s4 = inlined_call_operand.vmem [shape: f32[1,512], index: 4, kind: input, shape index: {}]   ;;  %s3316_s5 = inlined_call_operand.vmem [shape: bf16[128,256], index: 5, kind: input, shape index: {}]   ;;  %s3317_s6 = inlined_call_operand.vmem [shape: f32[1,256], index: 6, kind: input, shape index: {}]   ;;  %s3318_s7 = inlined_call_operand.hbm [shape: f32[9,16,256], index: 7, kind: output, shape index: {}]  }
   0x1   :  { %14 = vsyncpa [#allocation4 + $0x1], 0  ;;  %s2066_s24 = smov 0   ;;  %s2068_s25 = smov 0  }
   0x2   :  { %s2070_s26 = smov 0   ;;  %s2072_s27 = smov 0  }
   0x3 LB: > { %s1640_s28 = sadd.s32 4294967295, %s1999_s27   ;;  %s1641_s29 = sadd.s32 4294967294, %s1999_s27   ;;  %s1999_s27 = sphi %s2072_s27, %s3790_s27   ;;  %s1995_s26 = sphi %s2070_s26, %s3789_s26   ;;  %s1991_s25 = sphi %s2068_s25, %s3788_s25   ;;  %s1987_s24 = sphi %s2066_s24, %s3787_s24  }
   0x4   : > { %s2089_s30 = sadd.s32 1, %s1999_s27   ;;  %s27_s8 = sadd.s32 1, %s1995_s26 }
   0x5   : > { %s24_s9 = ssub.s32 %s1999_s27, %s2089_s30  ;;  %p34_p0 = scmp.ne.s32.totalorder %s1995_s26, %s1991_s25 }
   0x6   : > { %p25_p1 = scmp.eq.s32.totalorder %s24_s9, 0  ;;  %p35_p2 = scmp.eq.s32.totalorder %s1999_s27, 0 }
   0x7   : > { %p190_p3 = scmp.eq.s32.totalorder %s1640_s28, 1  ;;  %p195_p4 = scmp.ne.s32.totalorder %s1991_s25, %s1987_s24 }
   0x8   : > { %s2102_s10 = scalar_select %p25_p1, %s1995_s26, %s27_s8  }
   0x9   : > { %p36_p5 = por %p35_p2, %p34_p0  ;;  %p2104_p6 = por %p190_p3, %p34_p0 }
   0xa   : > { %p196_p7 = scmp.eq.s32.totalorder %s1641_s29, 1  ;;  %p1643_p9 = scmp.ge.s32.totalorder %s1999_s27, 2 }
   0xc   : > { %p2108_p8 = por %p196_p7, %p195_p4  ;;  %230 = sbr.rel (%p1643_p9) target bundleno = 29 (0x1d), region = 40 }
  0x13   : > { %233 = sbr.rel (!%p36_p5) target bundleno = 29 (0x1d), region = 44  ;;  %s235_s13 = sand.u32 (%p36_p5), 1, %s1995_s26  }
  0x14   : > { %s1644_s14 = sshll.u32 (%p36_p5), %s1999_s27, 2  ;;  %s1799_s15 = smul.u32 (%p36_p5), 36, %s235_s13 }
  0x15   : > { %s239_s18 = scalar_lea.vmem (%p36_p5), %s3311_s0, %s1644_s14 }
  0x16   : > { %v255_v0 = vld [vmem:[%s239_s18] sm:$0xf] (%p36_p5)  ;;  %v257_v1 = vld [vmem:[%s239_s18 + $0x8] sm:$0xf] (%p36_p5)  ;;  %v259_v2 = vld [vmem:[%s239_s18 + $0x10] sm:$0xf] (%p36_p5) }
  0x17   : > { %v261_v3 = vld [vmem:[%s239_s18 + $0x18] sm:$0xf] (%p36_p5)  ;;  %v263_v4 = vld [vmem:[%s239_s18 + $0x20] sm:$0xf] (%p36_p5)  ;;  %s237_s19 = scalar_lea.vmem (%p36_p5), [#allocation2], %s1799_s15 }
  0x18   : > { %256 = vst [vmem:[%s237_s19] sm:$0xf] (%p36_p5), %v255_v0  ;;  %258 = vst [vmem:[%s237_s19 + $0x4] sm:$0xf] (%p36_p5), %v257_v1  ;;  %v265_v5 = vld [vmem:[%s239_s18 + $0x28] sm:$0xf] (%p36_p5) }
  0x19   : > { %260 = vst [vmem:[%s237_s19 + $0x8] sm:$0xf] (%p36_p5), %v259_v2  ;;  %262 = vst [vmem:[%s237_s19 + $0xc] sm:$0xf] (%p36_p5), %v261_v3  ;;  %v267_v6 = vld [vmem:[%s239_s18 + $0x30] sm:$0xf] (%p36_p5) }
  0x1a   : > { %264 = vst [vmem:[%s237_s19 + $0x10] sm:$0xf] %v263_v4  ;;  %v269_v7 = vld [vmem:[%s239_s18 + $0x38] sm:$0xf]  ;;  %266 = vst [vmem:[%s237_s19 + $0x14] sm:$0xf] %v265_v5 }
  0x1b   : > { %268 = vst [vmem:[%s237_s19 + $0x18] sm:$0xf] %v267_v6  ;;  %270 = vst [vmem:[%s237_s19 + $0x1c] sm:$0xf] %v269_v7  ;;  %v271_v8 = vld [vmem:[%s239_s18 + $0x40] sm:$0xf] }
  0x1c   : > { %272 = vst [vmem:[%s237_s19 + $0x20] sm:$0xf] %v271_v8 }
  0x1d PF: > { %p1645_p10 = scmp.ge.s32.totalorder %s1999_s27, 1  ;;  %p312_p11 = scmp.lt.s32.totalorder %s1999_s27, 3 }
  0x1f   : > { %p313_p12 = pnand %p1645_p10, %p312_p11 }
  0x21   : > { %316 = sbr.rel (%p313_p12) target bundleno = 938 (0x3aa), region = 85 }
  0x28   : > { %s2123_s20 = sand.u32 1, %s1991_s25   ;;  %v2128_v9 = vld [vmem:[%s3312_s1] sm:$0xff]  ;;  %v2133_v10 = vld [vmem:[%s3312_s1 + $0x8] sm:$0xff]  ;;  %v2138_v11 = vld [vmem:[%s3312_s1 + $0x10] sm:$0xff]  ;;  %s2906_s18 = smov 0  }
  0x29   : > { %3527 = vst [vmem:[#allocation6_spill] sm:$0xff] %v2128_v9  ;;  %3528 = vst [vmem:[#allocation7_spill] sm:$0xff] %v2133_v10  ;;  %s1800_s13 = smul.u32 36, %s2123_s20  ;;  %v2144_v12 = vld [vmem:[%s3312_s1 + $0x18] sm:$0xff]  ;;  %v2149_v13 = vld [vmem:[%s3312_s1 + $0x20] sm:$0xff] }
  0x2a   : > { %3529 = vst [vmem:[#allocation8_spill] sm:$0xff] %v2138_v11  ;;  %3530 = vst [vmem:[#allocation9_spill] sm:$0xff] %v2144_v12  ;;  %v2154_v14 = vld [vmem:[%s3312_s1 + $0x28] sm:$0xff]  ;;  %s1801_s21 = smul.u32 144, %s2123_s20  ;;  %v2160_v15 = vld [vmem:[%s3312_s1 + $0x30] sm:$0xff] }
  0x2b   : > { %3531 = vst [vmem:[#allocation10_spill] sm:$0xff] %v2149_v13  ;;  %3532 = vst [vmem:[#allocation11_spill] sm:$0xff] %v2154_v14  ;;  %v2165_v16 = vld [vmem:[%s3312_s1 + $0x38] sm:$0xff]  ;;  %v2170_v17 = vld [vmem:[%s3312_s1 + $0x40] sm:$0xff]  ;;  %s2892_s16 = scalar_lea.vmem [#allocation2], %s1800_s13 }
  0x2c   : > { %3533 = vst [vmem:[#allocation12_spill] sm:$0xff] %v2160_v15  ;;  %3534 = vst [vmem:[#allocation13_spill] sm:$0xff] %v2165_v16  ;;  %v2175_v18 = vld [vmem:[%s3312_s1 + $0x48] sm:$0xff]  ;;  %v2180_v19 = vld [vmem:[%s3312_s1 + $0x50] sm:$0xff]  ;;  %s2896_s17 = scalar_lea.vmem [#allocation3], %s1801_s21 }
  0x2d   : > { %3535 = vst [vmem:[#allocation14_spill] sm:$0xff] %v2170_v17  ;;  %3536 = vst [vmem:[#allocation15_spill] sm:$0xff] %v2175_v18  ;;  %v2185_v20 = vld [vmem:[%s3312_s1 + $0x58] sm:$0xff]  ;;  %v2190_v21 = vld [vmem:[%s3312_s1 + $0x60] sm:$0xff] }
  0x2e   : > { %3537 = vst [vmem:[#allocation16_spill] sm:$0xff] %v2180_v19  ;;  %3538 = vst [vmem:[#allocation17_spill] sm:$0xff] %v2185_v20  ;;  %v2195_v22 = vld [vmem:[%s3312_s1 + $0x68] sm:$0xff]  ;;  %v2200_v23 = vld [vmem:[%s3312_s1 + $0x70] sm:$0xff] }
  0x2f   : > { %3539 = vst [vmem:[#allocation18_spill] sm:$0xff] %v2190_v21  ;;  %3540 = vst [vmem:[#allocation19_spill] sm:$0xff] %v2195_v22  ;;  %v2205_v24 = vld [vmem:[%s3312_s1 + $0x78] sm:$0xff]  ;;  %v2210_v25 = vld [vmem:[%s3312_s1 + $0x80] sm:$0xff] }
  0x30   : > { %3541 = vst [vmem:[#allocation20_spill] sm:$0xff] %v2200_v23  ;;  %3542 = vst [vmem:[#allocation21_spill] sm:$0xff] %v2205_v24  ;;  %v2215_v26 = vld [vmem:[%s3312_s1 + $0x88] sm:$0xff]  ;;  %v2220_v27 = vld [vmem:[%s3312_s1 + $0x90] sm:$0xff] }
  0x31   : > { %3543 = vst [vmem:[#allocation22_spill] sm:$0xff] %v2210_v25  ;;  %3544 = vst [vmem:[#allocation23_spill] sm:$0xff] %v2215_v26  ;;  %v2225_v28 = vld [vmem:[%s3312_s1 + $0x98] sm:$0xff]  ;;  %v2230_v29 = vld [vmem:[%s3312_s1 + $0xa0] sm:$0xff] }
  0x32   : > { %v2235_v30 = vld [vmem:[%s3312_s1 + $0xa8] sm:$0xff]  ;;  %v2240_v31 = vld [vmem:[%s3312_s1 + $0xb0] sm:$0xff]  ;;  %v2245_v32 = vld [vmem:[%s3312_s1 + $0xb8] sm:$0xff] }
  0x33   : > { %v2250_v33 = vld [vmem:[%s3312_s1 + $0xc0] sm:$0xff]  ;;  %v2255_v34 = vld [vmem:[%s3312_s1 + $0xc8] sm:$0xff]  ;;  %v2260_v35 = vld [vmem:[%s3312_s1 + $0xd0] sm:$0xff] }
  0x34   : > { %v2265_v36 = vld [vmem:[%s3312_s1 + $0xd8] sm:$0xff]  ;;  %v2270_v37 = vld [vmem:[%s3312_s1 + $0xe0] sm:$0xff]  ;;  %v2275_v38 = vld [vmem:[%s3312_s1 + $0xe8] sm:$0xff] }
  0x35   : > { %v2280_v39 = vld [vmem:[%s3312_s1 + $0xf0] sm:$0xff]  ;;  %v2285_v40 = vld [vmem:[%s3312_s1 + $0xf8] sm:$0xff]  ;;  %v2290_v41 = vld [vmem:[%s3312_s1 + $0x100] sm:$0xff] }
  0x36   : > { %v2295_v42 = vld [vmem:[%s3312_s1 + $0x108] sm:$0xff]  ;;  %v2300_v43 = vld [vmem:[%s3312_s1 + $0x110] sm:$0xff]  ;;  %v2305_v44 = vld [vmem:[%s3312_s1 + $0x118] sm:$0xff] }
  0x37   : > { %v2310_v45 = vld [vmem:[%s3312_s1 + $0x120] sm:$0xff]  ;;  %v2315_v46 = vld [vmem:[%s3312_s1 + $0x128] sm:$0xff]  ;;  %v2320_v47 = vld [vmem:[%s3312_s1 + $0x130] sm:$0xff] }
  0x38   : > { %v2325_v48 = vld [vmem:[%s3312_s1 + $0x138] sm:$0xff]  ;;  %v2330_v49 = vld [vmem:[%s3312_s1 + $0x140] sm:$0xff]  ;;  %v2335_v50 = vld [vmem:[%s3312_s1 + $0x148] sm:$0xff] }
  0x39   : > { %v2340_v51 = vld [vmem:[%s3312_s1 + $0x150] sm:$0xff]  ;;  %v2345_v52 = vld [vmem:[%s3312_s1 + $0x158] sm:$0xff]  ;;  %v2350_v53 = vld [vmem:[%s3312_s1 + $0x160] sm:$0xff] }
  0x3a   : > { %v2355_v54 = vld [vmem:[%s3312_s1 + $0x168] sm:$0xff]  ;;  %v2360_v55 = vld [vmem:[%s3312_s1 + $0x170] sm:$0xff]  ;;  %v2365_v56 = vld [vmem:[%s3312_s1 + $0x178] sm:$0xff] }
  0x3b   : > { %v2370_v57 = vld [vmem:[%s3312_s1 + $0x180] sm:$0xff]  ;;  %v2375_v58 = vld [vmem:[%s3312_s1 + $0x188] sm:$0xff]  ;;  %v2380_v59 = vld [vmem:[%s3312_s1 + $0x190] sm:$0xff] }
  0x3c   : > { %v2385_v60 = vld [vmem:[%s3312_s1 + $0x198] sm:$0xff]  ;;  %v2390_v61 = vld [vmem:[%s3312_s1 + $0x1a0] sm:$0xff]  ;;  %v2395_v62 = vld [vmem:[%s3312_s1 + $0x1a8] sm:$0xff] }
  0x3d   : > { %3545 = vst [vmem:[#allocation24_spill] sm:$0xff] %v2390_v61  ;;  %3546 = vst [vmem:[#allocation25_spill] sm:$0xff] %v2395_v62  ;;  %v2400_v63 = vld [vmem:[%s3312_s1 + $0x1b0] sm:$0xff]  ;;  %v2405_v0 = vld [vmem:[%s3312_s1 + $0x1b8] sm:$0xff] }
  0x3e   : > { %3547 = vst [vmem:[#allocation26_spill] sm:$0xff] %v2405_v0  ;;  %v2410_v1 = vld [vmem:[%s3312_s1 + $0x1c0] sm:$0xff]  ;;  %v2415_v2 = vld [vmem:[%s3312_s1 + $0x1c8] sm:$0xff]  ;;  %v2420_v3 = vld [vmem:[%s3312_s1 + $0x1d0] sm:$0xff] }
  0x3f   : > { %3548 = vst [vmem:[#allocation27_spill] sm:$0xff] %v2410_v1  ;;  %3549 = vst [vmem:[#allocation28_spill] sm:$0xff] %v2415_v2  ;;  %v2425_v4 = vld [vmem:[%s3312_s1 + $0x1d8] sm:$0xff]  ;;  %v2430_v5 = vld [vmem:[%s3312_s1 + $0x1e0] sm:$0xff] }
  0x40   : > { %3550 = vst [vmem:[#allocation29_spill] sm:$0xff] %v2420_v3  ;;  %3551 = vst [vmem:[#allocation30_spill] sm:$0xff] %v2425_v4  ;;  %v2435_v6 = vld [vmem:[%s3312_s1 + $0x1e8] sm:$0xff]  ;;  %v2440_v7 = vld [vmem:[%s3312_s1 + $0x1f0] sm:$0xff] }
  0x41   : > { %3552 = vst [vmem:[#allocation31_spill] sm:$0xff] %v2430_v5  ;;  %3553 = vst [vmem:[#allocation32_spill] sm:$0xff] %v2435_v6  ;;  %v2445_v8 = vld [vmem:[%s3312_s1 + $0x1f8] sm:$0xff]  ;;  %v2450_v2 = vld [vmem:[%s3314_s3] sm:$0xff] }
  0x42   : > { %3554 = vst [vmem:[#allocation33_spill] sm:$0xff] %v2440_v7  ;;  %3555 = vst [vmem:[#allocation34_spill] sm:$0xff] %v2445_v8  ;;  %v2455_v5 = vld [vmem:[%s3314_s3 + $0x8] sm:$0xff]  ;;  %v2460_v6 = vld [vmem:[%s3314_s3 + $0x10] sm:$0xff] }
  0x43   : > { %3556 = vst [vmem:[#allocation35_spill] sm:$0xff] %v2450_v2  ;;  %3557 = vst [vmem:[#allocation36_spill] sm:$0xff] %v2455_v5  ;;  %v2465_v7 = vld [vmem:[%s3314_s3 + $0x18] sm:$0xff]  ;;  %v2470_v8 = vld [vmem:[%s3314_s3 + $0x20] sm:$0xff] }
  0x44   : > { %3558 = vst [vmem:[#allocation37_spill] sm:$0xff] %v2460_v6  ;;  %3559 = vst [vmem:[#allocation38_spill] sm:$0xff] %v2465_v7  ;;  %v2475_v2 = vld [vmem:[%s3314_s3 + $0x28] sm:$0xff]  ;;  %v2480_v5 = vld [vmem:[%s3314_s3 + $0x30] sm:$0xff] }
  0x45   : > { %3560 = vst [vmem:[#allocation39_spill] sm:$0xff] %v2470_v8  ;;  %3561 = vst [vmem:[#allocation40_spill] sm:$0xff] %v2475_v2  ;;  %v2485_v6 = vld [vmem:[%s3314_s3 + $0x38] sm:$0xff]  ;;  %v2490_v7 = vld [vmem:[%s3314_s3 + $0x40] sm:$0xff] }
  0x46   : > { %3562 = vst [vmem:[#allocation41_spill] sm:$0xff] %v2480_v5  ;;  %3563 = vst [vmem:[#allocation42_spill] sm:$0xff] %v2485_v6  ;;  %v2495_v8 = vld [vmem:[%s3314_s3 + $0x48] sm:$0xff]  ;;  %v2500_v2 = vld [vmem:[%s3314_s3 + $0x50] sm:$0xff] }
  0x47   : > { %3564 = vst [vmem:[#allocation43_spill] sm:$0xff] %v2490_v7  ;;  %3565 = vst [vmem:[#allocation44_spill] sm:$0xff] %v2495_v8  ;;  %v2505_v5 = vld [vmem:[%s3314_s3 + $0x58] sm:$0xff]  ;;  %v2510_v6 = vld [vmem:[%s3314_s3 + $0x60] sm:$0xff] }
  0x48   : > { %3566 = vst [vmem:[#allocation45_spill] sm:$0xff] %v2500_v2  ;;  %3567 = vst [vmem:[#allocation46_spill] sm:$0xff] %v2505_v5  ;;  %v2515_v7 = vld [vmem:[%s3314_s3 + $0x68] sm:$0xff]  ;;  %v2520_v8 = vld [vmem:[%s3314_s3 + $0x70] sm:$0xff] }
  0x49   : > { %3568 = vst [vmem:[#allocation47_spill] sm:$0xff] %v2510_v6  ;;  %3569 = vst [vmem:[#allocation48_spill] sm:$0xff] %v2515_v7  ;;  %v2525_v2 = vld [vmem:[%s3314_s3 + $0x78] sm:$0xff]  ;;  %v2530_v5 = vld [vmem:[%s3314_s3 + $0x80] sm:$0xff] }
  0x4a   : > { %3570 = vst [vmem:[#allocation49_spill] sm:$0xff] %v2520_v8  ;;  %3571 = vst [vmem:[#allocation50_spill] sm:$0xff] %v2525_v2  ;;  %v2535_v6 = vld [vmem:[%s3314_s3 + $0x88] sm:$0xff]  ;;  %v2540_v7 = vld [vmem:[%s3314_s3 + $0x90] sm:$0xff] }
  0x4b   : > { %3572 = vst [vmem:[#allocation51_spill] sm:$0xff] %v2530_v5  ;;  %3573 = vst [vmem:[#allocation52_spill] sm:$0xff] %v2535_v6  ;;  %v2545_v8 = vld [vmem:[%s3314_s3 + $0x98] sm:$0xff]  ;;  %v2550_v2 = vld [vmem:[%s3314_s3 + $0xa0] sm:$0xff] }
  0x4c   : > { %3574 = vst [vmem:[#allocation53_spill] sm:$0xff] %v2540_v7  ;;  %3575 = vst [vmem:[#allocation54_spill] sm:$0xff] %v2545_v8  ;;  %v2555_v5 = vld [vmem:[%s3314_s3 + $0xa8] sm:$0xff]  ;;  %v2560_v6 = vld [vmem:[%s3314_s3 + $0xb0] sm:$0xff] }
  0x4d   : > { %3576 = vst [vmem:[#allocation55_spill] sm:$0xff] %v2550_v2  ;;  %3577 = vst [vmem:[#allocation56_spill] sm:$0xff] %v2555_v5  ;;  %v2565_v7 = vld [vmem:[%s3314_s3 + $0xb8] sm:$0xff]  ;;  %v2570_v8 = vld [vmem:[%s3314_s3 + $0xc0] sm:$0xff] }
  0x4e   : > { %3578 = vst [vmem:[#allocation57_spill] sm:$0xff] %v2560_v6  ;;  %3579 = vst [vmem:[#allocation58_spill] sm:$0xff] %v2565_v7  ;;  %v2575_v2 = vld [vmem:[%s3314_s3 + $0xc8] sm:$0xff]  ;;  %v2580_v5 = vld [vmem:[%s3314_s3 + $0xd0] sm:$0xff] }
  0x4f   : > { %3580 = vst [vmem:[#allocation59_spill] sm:$0xff] %v2570_v8  ;;  %3581 = vst [vmem:[#allocation60_spill] sm:$0xff] %v2575_v2  ;;  %v2585_v6 = vld [vmem:[%s3314_s3 + $0xd8] sm:$0xff]  ;;  %v2590_v7 = vld [vmem:[%s3314_s3 + $0xe0] sm:$0xff]  ;;  %v481_v8 = vlaneseq }
  0x50   : > { %3582 = vst [vmem:[#allocation61_spill] sm:$0xff] %v2580_v5  ;;  %3583 = vst [vmem:[#allocation62_spill] sm:$0xff] %v2585_v6  ;;  %v2595_v2 = vld [vmem:[%s3314_s3 + $0xe8] sm:$0xff]  ;;  %v2600_v5 = vld [vmem:[%s3314_s3 + $0xf0] sm:$0xff] }
  0x51   : > { %3584 = vst [vmem:[#allocation63_spill] sm:$0xff] %v2590_v7  ;;  %3585 = vst [vmem:[#allocation64_spill] sm:$0xff] %v2595_v2  ;;  %v2605_v6 = vld [vmem:[%s3314_s3 + $0xf8] sm:$0xff]  ;;  %v2610_v7 = vld [vmem:[%s3314_s3 + $0x100] sm:$0xff] }
  0x52   : > { %3586 = vst [vmem:[#allocation65_spill] sm:$0xff] %v2600_v5  ;;  %3587 = vst [vmem:[#allocation66_spill] sm:$0xff] %v2605_v6  ;;  %v2615_v4 = vld [vmem:[%s3314_s3 + $0x108] sm:$0xff]  ;;  %v2620_v2 = vld [vmem:[%s3314_s3 + $0x110] sm:$0xff] }
  0x53   : > { %3588 = vst [vmem:[#allocation67_spill] sm:$0xff] %v2610_v7  ;;  %3589 = vst [vmem:[#allocation68_spill] sm:$0xff] %v2615_v4  ;;  %v2625_v5 = vld [vmem:[%s3314_s3 + $0x118] sm:$0xff]  ;;  %v2630_v6 = vld [vmem:[%s3314_s3 + $0x120] sm:$0xff] }
  0x54   : > { %3590 = vst [vmem:[#allocation69_spill] sm:$0xff] %v2620_v2  ;;  %3591 = vst [vmem:[#allocation70_spill] sm:$0xff] %v2625_v5  ;;  %v2635_v7 = vld [vmem:[%s3314_s3 + $0x128] sm:$0xff]  ;;  %v2640_v4 = vld [vmem:[%s3314_s3 + $0x130] sm:$0xff] }
  0x55   : > { %3592 = vst [vmem:[#allocation71_spill] sm:$0xff] %v2630_v6  ;;  %3593 = vst [vmem:[#allocation72_spill] sm:$0xff] %v2635_v7  ;;  %v2645_v2 = vld [vmem:[%s3314_s3 + $0x138] sm:$0xff]  ;;  %v2650_v5 = vld [vmem:[%s3314_s3 + $0x140] sm:$0xff]  ;;  %v482_v6 = vshrl.u32 %v481_v8, 7 }
  0x56   : > { %3594 = vst [vmem:[#allocation73_spill] sm:$0xff] %v2640_v4  ;;  %3595 = vst [vmem:[#allocation74_spill] sm:$0xff] %v2645_v2  ;;  %v2655_v7 = vld [vmem:[%s3314_s3 + $0x148] sm:$0xff]  ;;  %v2660_v4 = vld [vmem:[%s3314_s3 + $0x150] sm:$0xff] }
  0x57   : > { %3596 = vst [vmem:[#allocation75_spill] sm:$0xff] %v2650_v5  ;;  %3597 = vst [vmem:[#allocation76_spill] sm:$0xff] %v2655_v7  ;;  %v2665_v2 = vld [vmem:[%s3314_s3 + $0x158] sm:$0xff]  ;;  %v2670_v5 = vld [vmem:[%s3314_s3 + $0x160] sm:$0xff]  ;;  %v2729_v1 = vsub.s32 1, %v482_v6  ;;  %v495_v3 = vsub.s32 3, %v482_v6 }
  0x58   : > { %3598 = vst [vmem:[#allocation77_spill] sm:$0xff] %v2660_v4  ;;  %3599 = vst [vmem:[#allocation78_spill] sm:$0xff] %v2665_v2  ;;  %v2675_v8 = vld [vmem:[%s3314_s3 + $0x168] sm:$0xff]  ;;  %v2680_v7 = vld [vmem:[%s3314_s3 + $0x170] sm:$0xff] }
  0x59   : > { %3600 = vst [vmem:[#allocation79_spill] sm:$0xff] %v2670_v5  ;;  %3601 = vst [vmem:[#allocation80_spill] sm:$0xff] %v2675_v8  ;;  %v2685_v4 = vld [vmem:[%s3314_s3 + $0x178] sm:$0xff]  ;;  %v2690_v2 = vld [vmem:[%s3314_s3 + $0x180] sm:$0xff] }
  0x5a   : > { %3602 = vst [vmem:[#allocation81_spill] sm:$0xff] %v2680_v7  ;;  %3603 = vst [vmem:[#allocation82_spill] sm:$0xff] %v2685_v4  ;;  %v2695_v5 = vld [vmem:[%s3314_s3 + $0x188] sm:$0xff]  ;;  %v2700_v8 = vld [vmem:[%s3314_s3 + $0x190] sm:$0xff] }
  0x5b   : > { %3604 = vst [vmem:[#allocation83_spill] sm:$0xff] %v2690_v2  ;;  %3605 = vst [vmem:[#allocation84_spill] sm:$0xff] %v2695_v5  ;;  %v2705_v7 = vld [vmem:[%s3314_s3 + $0x198] sm:$0xff]  ;;  %v2710_v4 = vld [vmem:[%s3314_s3 + $0x1a0] sm:$0xff]  ;;  %v2712_v2 = vsub.s32 0, %v482_v6 }
  0x5c   : > { %3606 = vst [vmem:[#allocation85_spill] sm:$0xff] %v2700_v8  ;;  %3607 = vst [vmem:[#allocation86_spill] sm:$0xff] %v2705_v7  ;;  %v2717_v5 = vld [vmem:[%s3314_s3 + $0x1a8] sm:$0xff]  ;;  %v2722_v8 = vld [vmem:[%s3314_s3 + $0x1b0] sm:$0xff] }
  0x5d   : > { %3608 = vst [vmem:[#allocation87_spill] sm:$0xff] %v2710_v4  ;;  %3609 = vst [vmem:[#allocation88_spill] sm:$0xff] %v2717_v5  ;;  %v2727_v7 = vld [vmem:[%s3314_s3 + $0x1b8] sm:$0xff]  ;;  %v491_v4 = vsub.s32 2, %v482_v6  ;;  %v2734_v62 = vld [vmem:[%s3314_s3 + $0x1c0] sm:$0xff] }
  0x5e   : > { %3610 = vst [vmem:[#allocation89_spill] sm:$0xff] %v2722_v8  ;;  %3611 = vst [vmem:[#allocation90_spill] sm:$0xff] %v2727_v7  ;;  %v2739_v5 = vld [vmem:[%s3314_s3 + $0x1c8] sm:$0xff]  ;;  %v2744_v8 = vld [vmem:[%s3314_s3 + $0x1d0] sm:$0xff] }
  0x5f   : > { %3612 = vst [vmem:[#allocation91_spill] sm:$0xff] %v2734_v62  ;;  %3613 = vst [vmem:[#allocation92_spill] sm:$0xff] %v2739_v5  ;;  %v2749_v7 = vld [vmem:[%s3314_s3 + $0x1d8] sm:$0xff]  ;;  %v2754_v6 = vld [vmem:[%s3314_s3 + $0x1e0] sm:$0xff] }
  0x60   : > { %3614 = vst [vmem:[#allocation93_spill] sm:$0xff] %v2744_v8  ;;  %3615 = vst [vmem:[#allocation94_spill] sm:$0xff] %v2749_v7  ;;  %v2759_v62 = vld [vmem:[%s3314_s3 + $0x1e8] sm:$0xff]  ;;  %v2764_v5 = vld [vmem:[%s3314_s3 + $0x1f0] sm:$0xff] }
  0x61   : > { %3616 = vst [vmem:[#allocation95_spill] sm:$0xff] %v2754_v6  ;;  %3617 = vst [vmem:[#allocation96_spill] sm:$0xff] %v2759_v62  ;;  %v2769_v8 = vld [vmem:[%s3314_s3 + $0x1f8] sm:$0xff]  ;;  %v2774_v7 = vld [vmem:[%s3313_s2] sm:$0xf] }
  0x62   : > { %3618 = vst [vmem:[#allocation97_spill] sm:$0xff] %v2764_v5  ;;  %3619 = vst [vmem:[#allocation98_spill] sm:$0xff] %v2769_v8  ;;  %v2781_v0 = vrot.slane %v2774_v7, %v491_v4  ;;  %v2784_v5 = vrot.slane %v2774_v7, %v495_v3  ;;  %v2789_v8 = vld [vmem:[%s3315_s4] sm:$0xf]  ;;  %v2799_v62 = vld [vmem:[%s3316_s5 + $0x8] sm:$0xff] }
  0x63   : > { %3620 = vst [vmem:[#allocation99_spill] sm:$0xff] %v2774_v7  ;;  %3623 = vst [vmem:[#allocation102_spill] sm:$0xff] %v2789_v8  ;;  %v2794_v61 = vld [vmem:[%s3316_s5] sm:$0xff]  ;;  %v2809_v7 = vrot.slane %v2789_v8, %v495_v3  ;;  %v2829_v3 = vld [vmem:[%s3316_s5 + $0x28] sm:$0xff] }
  0x64   : > { %3621 = vst [vmem:[#allocation100_spill] sm:$0xff] %v2781_v0  ;;  %3622 = vst [vmem:[#allocation101_spill] sm:$0xff] %v2784_v5  ;;  %v2806_v5 = vrot.slane %v2789_v8, %v491_v4  ;;  %v2824_v0 = vld [vmem:[%s3316_s5 + $0x20] sm:$0xff]  ;;  %v2834_v4 = vld [vmem:[%s3316_s5 + $0x30] sm:$0xff] }
  0x65   : > { %3624 = vst [vmem:[#allocation103_spill] sm:$0xff] %v2794_v61  ;;  %3625 = vst [vmem:[#allocation104_spill] sm:$0xff] %v2799_v62  ;;  %v2814_v61 = vld [vmem:[%s3316_s5 + $0x10] sm:$0xff]  ;;  %v2819_v62 = vld [vmem:[%s3316_s5 + $0x18] sm:$0xff] }
  0x66   : > { %3626 = vst [vmem:[#allocation105_spill] sm:$0xff] %v2806_v5  ;;  %3627 = vst [vmem:[#allocation106_spill] sm:$0xff] %v2809_v7  ;;  %v2839_v6 = vld [vmem:[%s3316_s5 + $0x38] sm:$0xff]  ;;  %v2844_v5 = vld [vmem:[%s3316_s5 + $0x40] sm:$0xff] }
  0x67   : > { %3628 = vst [vmem:[#allocation107_spill] sm:$0xff] %v2814_v61  ;;  %3629 = vst [vmem:[#allocation108_spill] sm:$0xff] %v2819_v62  ;;  %v2849_v7 = vld [vmem:[%s3316_s5 + $0x48] sm:$0xff]  ;;  %v2854_v8 = vld [vmem:[%s3316_s5 + $0x50] sm:$0xff] }
  0x68   : > { %3630 = vst [vmem:[#allocation109_spill] sm:$0xff] %v2824_v0  ;;  %3631 = vst [vmem:[#allocation110_spill] sm:$0xff] %v2829_v3  ;;  %v2902_v0 = vmov 0   ;;  %v2904_v3 = vmov 0  }
  0x69   : > { %3632 = vst [vmem:[#allocation111_spill] sm:$0xff] %v2834_v4  ;;  %3633 = vst [vmem:[#allocation112_spill] sm:$0xff] %v2839_v6  ;;  %v2859_v4 = vld [vmem:[%s3316_s5 + $0x58] sm:$0xff]  ;;  %v2864_v6 = vld [vmem:[%s3316_s5 + $0x60] sm:$0xff] }
  0x6a   : > { %3634 = vst [vmem:[#allocation113_spill] sm:$0xff] %v2844_v5  ;;  %3635 = vst [vmem:[#allocation114_spill] sm:$0xff] %v2849_v7  ;;  %v2869_v5 = vld [vmem:[%s3316_s5 + $0x68] sm:$0xff]  ;;  %v2874_v7 = vld [vmem:[%s3316_s5 + $0x70] sm:$0xff] }
  0x6b   : > { %3636 = vst [vmem:[#allocation115_spill] sm:$0xff] %v2854_v8  ;;  %3637 = vst [vmem:[#allocation116_spill] sm:$0xff] %v2859_v4  ;;  %v2879_v8 = vld [vmem:[%s3316_s5 + $0x78] sm:$0xff]  ;;  %v2884_v4 = vld [vmem:[%s3317_s6] sm:$0x3] }
  0x6c   : > { %3638 = vst [vmem:[#allocation117_spill] sm:$0xff] %v2864_v6  ;;  %3639 = vst [vmem:[#allocation118_spill] sm:$0xff] %v2869_v5 }
  0x6d   : > { %3640 = vst [vmem:[#allocation119_spill] sm:$0xff] %v2874_v7  ;;  %3641 = vst [vmem:[#allocation120_spill] sm:$0xff] %v2879_v8  ;;  %v2898_v7 = vmov 0.0   ;;  %v2900_v8 = vmov 0.0  }
  0x6e   : > { %3642 = vst [vmem:[#allocation121_spill] sm:$0xff] %v2884_v4 }
  0x6f LB: >> { %v3643_v26 = vld [vmem:[#allocation23_spill] sm:$0xff]  ;;  %v3644_v25 = vld [vmem:[#allocation22_spill] sm:$0xff]  ;;  %v3645_v24 = vld [vmem:[#allocation21_spill] sm:$0xff]  ;;  %3661 = vst [vmem:[#allocation122_spill] sm:$0xff] %v2003_v7  ;;  %916 = vmatprep.mubr.bf16.mxu0 %v2015_v3  ;;  %957 = vmatprep.mubr.bf16.mxu1 %v2015_v3  ;;  %s1646_s13 = sshll.u32 %s2019_s18, 2  ;;  %s1797_s19 = sshll.u32 %s2019_s18, 4  ;;  %v2011_v0 = vphi %v2902_v0, %v1411_v0   ;;  %v2007_v8 = vphi %v2900_v8, %v3190_v8   ;;  %v2003_v7 = vphi %v2898_v7, %v1408_v7   ;;  %s2019_s18 = sphi %s2906_s18, %s556_s18   ;;  %v2015_v3 = vphi %v2904_v3, %v3193_v3  }
  0x70   : >> { %v3646_v23 = vld [vmem:[#allocation20_spill] sm:$0xff]  ;;  %v3647_v22 = vld [vmem:[#allocation19_spill] sm:$0xff]  ;;  %v3648_v21 = vld [vmem:[#allocation18_spill] sm:$0xff]  ;;  %3662 = vst [vmem:[#allocation123_spill] sm:$0xff] %v2007_v8  ;;  %v1663_v3 = vcombine.low %v3644_v25, %v2220_v27  ;;  %s562_s21 = scalar_lea.vmem %s2892_s16, %s1646_s13 [#allocation2]  ;;  %s1535_s22 = scalar_lea.vmem %s2896_s17, %s1797_s19 [#allocation3] }
  0x71   : >> { %v3649_v20 = vld [vmem:[#allocation17_spill] sm:$0xff]  ;;  %v3650_v19 = vld [vmem:[#allocation16_spill] sm:$0xff]  ;;  %v3651_v18 = vld [vmem:[#allocation15_spill] sm:$0xff]  ;;  %s556_s18 = sadd.s32 1, %s2019_s18  }
  0x72   : >> { %v3652_v17 = vld [vmem:[#allocation14_spill] sm:$0xff]  ;;  %v3653_v16 = vld [vmem:[#allocation13_spill] sm:$0xff]  ;;  %v3654_v15 = vld [vmem:[#allocation12_spill] sm:$0xff]  ;;  %p553_p13 = scmp.ge.s32.totalorder %s556_s18, 9  }
  0x73   : >> { %v3655_v14 = vld [vmem:[#allocation11_spill] sm:$0xff]  ;;  %v3656_v13 = vld [vmem:[#allocation10_spill] sm:$0xff]  ;;  %v3657_v12 = vld [vmem:[#allocation9_spill] sm:$0xff]  ;;  %s1798_s23 = sshll.u32 (%p553_p13), %s1640_s28, 8  ;;  %s1552_s14 = sshll.u32 (%p553_p13), %s2896_s17, 4  ;;  %s3267_s14 = int_to_ptr.vmem [resolvable:$true] %s1552_s14 }
  0x74   : >> { %v3658_v10 = vld [vmem:[#allocation7_spill] sm:$0xff]  ;;  %v3659_v11 = vld [vmem:[#allocation8_spill] sm:$0xff]  ;;  %v3660_v9 = vld [vmem:[#allocation6_spill] sm:$0xff]  ;;  %v1652_v4 = vcombine.high %v3656_v13, %v3654_v15  ;;  %v1654_v62 = vcombine.high %v3655_v14, %v3653_v16  ;;  %v1651_v8 = vcombine.low %v3656_v13, %v3654_v15  ;;  %s3264_s9 = scalar_lea.hbm (%p553_p13), %s3318_s7, %s1798_s23  ;;  %s1539_s15 = scalar_lea.sflag (%p553_p13), [#allocation4], %s2123_s20 }
  0x75   : >> { %v1648_v5 = vcombine.high %v3660_v9, %v3659_v11  ;;  %v1647_v6 = vcombine.low %v3660_v9, %v3659_v11  ;;  %v1650_v7 = vcombine.high %v3658_v10, %v3657_v12  ;;  %v1649_v61 = vcombine.low %v3658_v10, %v3657_v12  ;;  %v3667_v13 = vld [vmem:[#allocation25_spill] sm:$0xff]  ;;  %v3669_v15 = vld [vmem:[#allocation27_spill] sm:$0xff]  ;;  %s1917_s18 = scalar_lea.vmem (%p553_p13), %s3267_s14, 2304  ;;  %s2022_s16 = smov (%p553_p13), [#allocation3]  }
  0x76   : >> { %v1656_v9 = vcombine.high %v3652_v17, %v3650_v19  ;;  %v1653_v11 = vcombine.low %v3655_v14, %v3653_v16  ;;  %v3668_v14 = vld [vmem:[#allocation29_spill] sm:$0xff]  ;;  %p1918_p0 = scmp.ne.s32.totalorder (%p553_p13), %s3267_s14, %s1917_s18  ;;  %s1921_s13 = sshll.u32 (%p553_p13), %s2022_s16, 4  ;;  %s1922_s13 = int_to_ptr.vmem [resolvable:$false] %s1921_s13 }
  0x77   : >> { %884 = vmatprep.subr.bf16.mxu0 %v1648_v5  ;;  %925 = vmatprep.subr.bf16.mxu1 %v1650_v7  ;;  %v1658_v5 = vcombine.high %v3651_v18, %v3649_v20  ;;  %v1660_v7 = vcombine.high %v3648_v21, %v3646_v23  ;;  %s1923_s28 = scalar_lea.vmem (%p553_p13), %s1922_s13, 4608  ;;  %p1924_p3 = scmp.lt.s32.totalorder (%p553_p13), %s3267_s14, %s1922_s13 }
  0x78   : >> { %885 = vmatpush1.bf16.msra.mxu0 %v1647_v6  ;;  %926 = vmatpush1.bf16.msra.mxu1 %v1649_v61  ;;  %v1655_v6 = vcombine.low %v3652_v17, %v3650_v19  ;;  %v1657_v61 = vcombine.low %v3651_v18, %v3649_v20  ;;  %v3675_v19 = vld [vmem:[#allocation31_spill] sm:$0xff]  ;;  %v3676_v20 = vld [vmem:[#allocation34_spill] sm:$0xff]  ;;  %p1919_p1 = pnand (%p553_p13), %p1918_p0, %p2104_p6  ;;  %p1925_p4 = scmp.lt.s32.totalorder (%p553_p13), %s1923_s28, %s1917_s18 }
  0x79   : >> { %886 = vmatprep.subr.bf16.mxu0 %v1652_v4  ;;  %927 = vmatprep.subr.bf16.mxu1 %v1654_v62  ;;  %v1662_v62 = vcombine.high %v3647_v22, %v3645_v24  ;;  %v1666_v4 = vcombine.high %v3643_v26, %v2225_v28 }
  0x7a   : > { %p1920_p2 = pneg (%p553_p13), %p1919_p1  ;;  %p1926_p5 = por (%p553_p13), %p1925_p4, %p1924_p3 }
  0x7c   : >> { %887 = vmatpush1.bf16.msra.mxu0 %v1651_v8  ;;  %928 = vmatpush1.bf16.msra.mxu1 %v1653_v11  ;;  %v1659_v8 = vcombine.low %v3648_v21, %v3646_v23  ;;  %v1661_v11 = vcombine.low %v3647_v22, %v3645_v24  ;;  %p1927_p7 = pnand (%p553_p13), %p1926_p5, %p1920_p2 }
  0x7d   : >> { %888 = vmatprep.subr.bf16.mxu0 %v1656_v9  ;;  %929 = vmatprep.subr.bf16.mxu1 %v1658_v5  ;;  %v1664_v9 = vcombine.high %v3644_v25, %v2220_v27  ;;  %v1668_v5 = vcombine.high %v2230_v29, %v2240_v31 }
  0x80   : >> { %889 = vmatpush1.bf16.msra.mxu0 %v1655_v6  ;;  %930 = vmatpush1.bf16.msra.mxu1 %v1657_v61  ;;  %v1665_v6 = vcombine.low %v3643_v26, %v2225_v28  ;;  %v1667_v61 = vcombine.low %v2230_v29, %v2240_v31 }
  0x81   : >> { %890 = vmatprep.subr.bf16.mxu0 %v1660_v7  ;;  %931 = vmatprep.subr.bf16.mxu1 %v1662_v62  ;;  %v1670_v7 = vcombine.high %v2235_v30, %v2245_v32  ;;  %v1672_v62 = vcombine.high %v2250_v33, %v2260_v35 }
  0x84   : >> { %891 = vmatpush1.bf16.msra.mxu0 %v1659_v8  ;;  %932 = vmatpush1.bf16.msra.mxu1 %v1661_v11  ;;  %v1669_v8 = vcombine.low %v2235_v30, %v2245_v32  ;;  %v1671_v11 = vcombine.low %v2250_v33, %v2260_v35 }
  0x85   : >> { %892 = vmatprep.subr.bf16.mxu0 %v1664_v9  ;;  %933 = vmatprep.subr.bf16.mxu1 %v1666_v4  ;;  %v1674_v9 = vcombine.high %v2255_v34, %v2265_v36  ;;  %v1676_v4 = vcombine.high %v2270_v37, %v2280_v39 }
  0x88   : >> { %893 = vmatpush1.bf16.msra.mxu0 %v1663_v3  ;;  %934 = vmatpush1.bf16.msra.mxu1 %v1665_v6  ;;  %v1673_v3 = vcombine.low %v2255_v34, %v2265_v36  ;;  %v1675_v6 = vcombine.low %v2270_v37, %v2280_v39 }
  0x89   : >> { %894 = vmatprep.subr.bf16.mxu0 %v1668_v5  ;;  %935 = vmatprep.subr.bf16.mxu1 %v1670_v7  ;;  %v1678_v5 = vcombine.high %v2275_v38, %v2285_v40  ;;  %v1680_v7 = vcombine.high %v2290_v41, %v2300_v43 }
  0x8c   : >> { %895 = vmatpush1.bf16.msra.mxu0 %v1667_v61  ;;  %936 = vmatpush1.bf16.msra.mxu1 %v1669_v8  ;;  %v1677_v61 = vcombine.low %v2275_v38, %v2285_v40  ;;  %v1679_v8 = vcombine.low %v2290_v41, %v2300_v43 }
  0x8d   : >> { %896 = vmatprep.subr.bf16.mxu0 %v1672_v62  ;;  %937 = vmatprep.subr.bf16.mxu1 %v1674_v9  ;;  %v1682_v62 = vcombine.high %v2295_v42, %v2305_v44  ;;  %v1684_v9 = vcombine.high %v2310_v45, %v2320_v47 }
  0x90   : >> { %897 = vmatpush1.bf16.msra.mxu0 %v1671_v11  ;;  %938 = vmatpush1.bf16.msra.mxu1 %v1673_v3  ;;  %v1681_v11 = vcombine.low %v2295_v42, %v2305_v44  ;;  %v1683_v3 = vcombine.low %v2310_v45, %v2320_v47 }
  0x91   : >> { %898 = vmatprep.subr.bf16.mxu0 %v1676_v4  ;;  %939 = vmatprep.subr.bf16.mxu1 %v1678_v5  ;;  %v1686_v4 = vcombine.high %v2315_v46, %v2325_v48  ;;  %v1688_v5 = vcombine.high %v2330_v49, %v2340_v51 }
  0x94   : >> { %899 = vmatpush1.bf16.msra.mxu0 %v1675_v6  ;;  %940 = vmatpush1.bf16.msra.mxu1 %v1677_v61  ;;  %v1685_v6 = vcombine.low %v2315_v46, %v2325_v48  ;;  %v1687_v61 = vcombine.low %v2330_v49, %v2340_v51 }
  0x95   : >> { %900 = vmatprep.subr.bf16.mxu0 %v1680_v7  ;;  %941 = vmatprep.subr.bf16.mxu1 %v1682_v62  ;;  %v1690_v7 = vcombine.high %v2335_v50, %v2345_v52  ;;  %v1692_v62 = vcombine.high %v2350_v53, %v2360_v55 }
  0x98   : >> { %901 = vmatpush1.bf16.msra.mxu0 %v1679_v8  ;;  %942 = vmatpush1.bf16.msra.mxu1 %v1681_v11  ;;  %v1689_v8 = vcombine.low %v2335_v50, %v2345_v52  ;;  %v1691_v11 = vcombine.low %v2350_v53, %v2360_v55 }
  0x99   : >> { %902 = vmatprep.subr.bf16.mxu0 %v1684_v9  ;;  %943 = vmatprep.subr.bf16.mxu1 %v1686_v4  ;;  %v1694_v9 = vcombine.high %v2355_v54, %v2365_v56  ;;  %v1696_v4 = vcombine.high %v2370_v57, %v2380_v59 }
  0x9c   : >> { %903 = vmatpush1.bf16.msra.mxu0 %v1683_v3  ;;  %944 = vmatpush1.bf16.msra.mxu1 %v1685_v6  ;;  %v1693_v3 = vcombine.low %v2355_v54, %v2365_v56  ;;  %v1695_v6 = vcombine.low %v2370_v57, %v2380_v59 }
  0x9d   : >> { %904 = vmatprep.subr.bf16.mxu0 %v1688_v5  ;;  %945 = vmatprep.subr.bf16.mxu1 %v1690_v7  ;;  %v1698_v5 = vcombine.high %v2375_v58, %v2385_v60  ;;  %v3663_v7 = vld [vmem:[#allocation24_spill] sm:$0xff] }
  0x9e   : >> { %v1700_v10 = vcombine.high %v3663_v7, %v2400_v63 }
  0xa0   : >> { %905 = vmatpush1.bf16.msra.mxu0 %v1687_v61  ;;  %946 = vmatpush1.bf16.msra.mxu1 %v1689_v8  ;;  %v3664_v61 = vmov %v3663_v7  ;;  %v3665_v8 = vld [vmem:[#allocation26_spill] sm:$0xff] }
  0xa1   : >> { %906 = vmatprep.subr.bf16.mxu0 %v1692_v62  ;;  %947 = vmatprep.subr.bf16.mxu1 %v1694_v9  ;;  %v1697_v62 = vcombine.low %v2375_v58, %v2385_v60  ;;  %v3666_v12 = vmov %v3665_v8  ;;  %v1702_v9 = vcombine.high %v3667_v13, %v3665_v8  ;;  %v3670_v7 = vld [vmem:[#allocation30_spill] sm:$0xff]  ;;  %v3673_v8 = vld [vmem:[#allocation33_spill] sm:$0xff] }
  0xa2   : >> { %v3671_v16 = vmov %v3670_v7  ;;  %v3674_v18 = vmov %v3673_v8 }
  0xa4   : >> { %907 = vmatpush1.bf16.msra.mxu0 %v1691_v11  ;;  %948 = vmatpush1.bf16.msra.mxu1 %v1693_v3  ;;  %v1699_v11 = vcombine.low %v3664_v61, %v2400_v63  ;;  %v1701_v3 = vcombine.low %v3667_v13, %v3666_v12  ;;  %v3677_v12 = vld [vmem:[#allocation32_spill] sm:$0xff] }
  0xa5   : >> { %908 = vmatprep.subr.bf16.mxu0 %v1696_v4  ;;  %949 = vmatprep.subr.bf16.mxu1 %v1698_v5  ;;  %v1704_v4 = vcombine.high %v3669_v15, %v3668_v14  ;;  %v3672_v5 = vld [vmem:[#allocation28_spill] sm:$0xff] }
  0xa6   : >> { %v1706_v17 = vcombine.high %v3672_v5, %v3670_v7  ;;  %v3678_v7 = vld [vmem:[#allocation37_spill] sm:$0xff] }
  0xa7   : >> { %v3679_v13 = vmov %v3678_v7 }
  0xa8   : >> { %909 = vmatpush1.bf16.msra.mxu0 %v1695_v6  ;;  %950 = vmatpush1.bf16.msra.mxu1 %v1697_v62  ;;  %v1703_v6 = vcombine.low %v3669_v15, %v3668_v14  ;;  %v1705_v62 = vcombine.low %v3672_v5, %v3671_v16  ;;  %v3682_v5 = vld [vmem:[#allocation38_spill] sm:$0xff]  ;;  %v3683_v15 = vld [vmem:[#allocation36_spill] sm:$0xff]  ;;  %v563_v16 = vld [vmem:[%s562_s21] sm:$0xf] }
  0xa9   : >> { %910 = vmatprep.subr.bf16.mxu0 %v1700_v10  ;;  %951 = vmatprep.subr.bf16.mxu1 %v1702_v9  ;;  %v1708_v10 = vcombine.high %v3675_v19, %v3673_v8  ;;  %v1710_v9 = vcombine.high %v3677_v12, %v3676_v20 }
  0xac   : >> { %911 = vmatpush1.bf16.msra.mxu0 %v1699_v11  ;;  %952 = vmatpush1.bf16.msra.mxu1 %v1701_v3  ;;  %v1707_v11 = vcombine.low %v3675_v19, %v3674_v18  ;;  %v3680_v3 = vld [vmem:[#allocation35_spill] sm:$0xff]  ;;  %v3686_v19 = vld [vmem:[#allocation42_spill] sm:$0xff] }
  0xad   : >> { %912 = vmatprep.subr.bf16.mxu0 %v1704_v4  ;;  %953 = vmatprep.subr.bf16.mxu1 %v1706_v17  ;;  %v1709_v4 = vcombine.low %v3677_v12, %v3676_v20  ;;  %v3681_v14 = vmov %v3680_v3  ;;  %v1712_v8 = vcombine.high %v3680_v3, %v3678_v7  ;;  %v1714_v17 = vcombine.high %v3683_v15, %v3682_v5  ;;  %v3685_v18 = vld [vmem:[#allocation39_spill] sm:$0xff]  ;;  %v3687_v7 = vld [vmem:[#allocation40_spill] sm:$0xff]  ;;  %v3689_v3 = vld [vmem:[#allocation45_spill] sm:$0xff] }
  0xae   : >> { %v3688_v20 = vmov %v3687_v7 }
  0xb0   : >> { %913 = vmatpush1.bf16.msra.mxu0 %v1703_v6  ;;  %954 = vmatpush1.bf16.msra.mxu1 %v1705_v62  ;;  %v1711_v6 = vcombine.low %v3681_v14, %v3679_v13  ;;  %v3684_v62 = vld [vmem:[#allocation41_spill] sm:$0xff]  ;;  %v3690_v13 = vmov %v3689_v3 }
  0xb1   : >> { %914 = vmatprep.subr.bf16.mxu0 %v1708_v10  ;;  %955 = vmatprep.subr.bf16.mxu1 %v1710_v9  ;;  %v1713_v10 = vcombine.low %v3683_v15, %v3682_v5  ;;  %v1716_v12 = vcombine.high %v3685_v18, %v3684_v62  ;;  %v1718_v9 = vcombine.high %v3687_v7, %v3686_v19  ;;  %v3693_v15 = vld [vmem:[#allocation46_spill] sm:$0xff] }
  0xb4   : >> { %915 = vmatpush1.bf16.msra.mxu0 %v1707_v11  ;;  %956 = vmatpush1.bf16.msra.mxu1 %v1709_v4  ;;  %v1715_v11 = vcombine.low %v3685_v18, %v3684_v62  ;;  %v1717_v4 = vcombine.low %v3688_v20, %v3686_v19  ;;  %v3697_v18 = vld [vmem:[#allocation50_spill] sm:$0xff]  ;;  %v3698_v19 = vld [vmem:[#allocation48_spill] sm:$0xff] }
  0xb5   : >> { %1308 = vmatprep.subr.bf16.mxu0 %v1712_v8  ;;  %1349 = vmatprep.subr.bf16.mxu1 %v1714_v17  ;;  %v3691_v8 = vld [vmem:[#allocation43_spill] sm:$0xff]  ;;  %v3694_v17 = vld [vmem:[#allocation44_spill] sm:$0xff] }
  0xb6   : >> { %v3692_v5 = vmov %v3691_v8  ;;  %v1720_v14 = vcombine.high %v3691_v8, %v3689_v3  ;;  %v1722_v21 = vcombine.high %v3694_v17, %v3693_v15  ;;  %v1726_v3 = vcombine.high %v3698_v19, %v3697_v18 }
  0xb7   : >> { %917 = vmatmul.mubr.bf16.vlgmr.msra.gmra.mrb[0].mxu0 %v563_v16  ;;  %958 = vmatmul.mubr.bf16.vlgmr.msra.gmra.mrb[0].mxu1 %v563_v16  ;;  %v1719_v16 = vcombine.low %v3692_v5, %v3690_v13  ;;  %v3701_v5 = vld [vmem:[#allocation54_spill] sm:$0xff] }
  0xb8   : >> { %1309 = vmatpush1.bf16.msra.mxu0 %v1711_v6  ;;  %1350 = vmatpush1.bf16.msra.mxu1 %v1713_v10  ;;  %v1721_v6 = vcombine.low %v3694_v17, %v3693_v15  ;;  %v3696_v10 = vld [vmem:[#allocation47_spill] sm:$0xff]  ;;  %v3708_v15 = vld [vmem:[#allocation56_spill] sm:$0xff] }
  0xb9   : >> { %1310 = vmatprep.subr.bf16.mxu0 %v1716_v12  ;;  %1351 = vmatprep.subr.bf16.mxu1 %v1718_v9  ;;  %v3695_v12 = vld [vmem:[#allocation49_spill] sm:$0xff] }
  0xba   : >> { %v1724_v7 = vcombine.high %v3696_v10, %v3695_v12  ;;  %v1723_v9 = vcombine.low %v3696_v10, %v3695_v12  ;;  %1340 = vmatprep.mubr.bf16.mxu0 %v2011_v0  ;;  %1381 = vmatprep.mubr.bf16.mxu1 %v2011_v0 }
  0xbc   : >> { %1311 = vmatpush1.bf16.msra.mxu0 %v1715_v11  ;;  %1352 = vmatpush1.bf16.msra.mxu1 %v1717_v4  ;;  %v3699_v11 = vld [vmem:[#allocation53_spill] sm:$0xff]  ;;  %v3700_v4 = vld [vmem:[#allocation51_spill] sm:$0xff] }
  0xbd   : >> { %1312 = vmatprep.subr.bf16.mxu0 %v1720_v14  ;;  %1353 = vmatprep.subr.bf16.mxu1 %v1722_v21  ;;  %v1725_v14 = vcombine.low %v3698_v19, %v3697_v18  ;;  %v1728_v8 = vcombine.high %v3700_v4, %v3699_v11  ;;  %v3702_v21 = vld [vmem:[#allocation52_spill] sm:$0xff] }
  0xbe   : >> { %v1730_v13 = vcombine.high %v3702_v21, %v3701_v5 }
  0xc0   : >> { %1313 = vmatpush1.bf16.msra.mxu0 %v1719_v16  ;;  %1354 = vmatpush1.bf16.msra.mxu1 %v1721_v6  ;;  %v1727_v16 = vcombine.low %v3700_v4, %v3699_v11  ;;  %v1729_v6 = vcombine.low %v3702_v21, %v3701_v5  ;;  %v3713_v5 = vld [vmem:[#allocation60_spill] sm:$0xff] }
  0xc1   : >> { %1314 = vmatprep.subr.bf16.mxu0 %v1724_v7  ;;  %1355 = vmatprep.subr.bf16.mxu1 %v1726_v3  ;;  %v3703_v7 = vld [vmem:[#allocation57_spill] sm:$0xff]  ;;  %v3705_v3 = vld [vmem:[#allocation55_spill] sm:$0xff]  ;;  %v3759_v21 = vld [vmem:[#allocation100_spill] sm:$0xff] }
  0xc2   : >> { %v3704_v10 = vmov %v3703_v7  ;;  %v3706_v12 = vmov %v3705_v3 }
  0xc3   : >> { %v1731_v18 = vcombine.low %v3706_v12, %v3704_v10  ;;  %v3717_v10 = vld [vmem:[#allocation64_spill] sm:$0xff] }
  0xc4   : >> { %1315 = vmatpush1.bf16.msra.mxu0 %v1723_v9  ;;  %1356 = vmatpush1.bf16.msra.mxu1 %v1725_v14  ;;  %v1732_v9 = vcombine.high %v3705_v3, %v3703_v7  ;;  %v3707_v14 = vld [vmem:[#allocation58_spill] sm:$0xff] }
  0xc5   : >> { %1316 = vmatprep.subr.bf16.mxu0 %v1728_v8  ;;  %1357 = vmatprep.subr.bf16.mxu1 %v1730_v13  ;;  %v1734_v17 = vcombine.high %v3708_v15, %v3707_v14  ;;  %v1733_v19 = vcombine.low %v3708_v15, %v3707_v14  ;;  %v3709_v8 = vld [vmem:[#allocation61_spill] sm:$0xff]  ;;  %v3711_v13 = vld [vmem:[#allocation59_spill] sm:$0xff] }
  0xc6   : >> { %v3710_v4 = vmov %v3709_v8 }
  0xc7   : >> { %v1735_v7 = vcombine.low %v3711_v13, %v3710_v4 }
  0xc8   : >> { %1317 = vmatpush1.bf16.msra.mxu0 %v1727_v16  ;;  %1358 = vmatpush1.bf16.msra.mxu1 %v1729_v6  ;;  %v1736_v16 = vcombine.high %v3711_v13, %v3709_v8  ;;  %v3712_v6 = vld [vmem:[#allocation62_spill] sm:$0xff] }
  0xc9   : >> { %1318 = vmatprep.subr.bf16.mxu0 %v1732_v9  ;;  %1359 = vmatprep.subr.bf16.mxu1 %v1734_v17  ;;  %v1738_v11 = vcombine.high %v3713_v5, %v3712_v6  ;;  %v1737_v3 = vcombine.low %v3713_v5, %v3712_v6  ;;  %v3714_v9 = vld [vmem:[#allocation65_spill] sm:$0xff]  ;;  %v3715_v17 = vld [vmem:[#allocation63_spill] sm:$0xff]  ;;  %v3722_v5 = vld [vmem:[#allocation68_spill] sm:$0xff] }
  0xca   : >> { %v1739_v8 = vcombine.low %v3715_v17, %v3714_v9 }
  0xcc   : >> { %1319 = vmatpush1.bf16.msra.mxu0 %v1731_v18  ;;  %1360 = vmatpush1.bf16.msra.mxu1 %v1733_v19  ;;  %v1740_v18 = vcombine.high %v3715_v17, %v3714_v9  ;;  %v3716_v19 = vld [vmem:[#allocation66_spill] sm:$0xff]  ;;  %v3726_v9 = vld [vmem:[#allocation72_spill] sm:$0xff] }
  0xcd   : >> { %1320 = vmatprep.subr.bf16.mxu0 %v1736_v16  ;;  %1361 = vmatprep.subr.bf16.mxu1 %v1738_v11  ;;  %v1742_v12 = vcombine.high %v3717_v10, %v3716_v19  ;;  %v1741_v14 = vcombine.low %v3717_v10, %v3716_v19  ;;  %v3718_v16 = vld [vmem:[#allocation69_spill] sm:$0xff]  ;;  %v3719_v11 = vld [vmem:[#allocation67_spill] sm:$0xff] }
  0xce   : >> { %v1743_v13 = vcombine.low %v3719_v11, %v3718_v16 }
  0xd0   : >> { %1321 = vmatpush1.bf16.msra.mxu0 %v1735_v7  ;;  %1362 = vmatpush1.bf16.msra.mxu1 %v1737_v3  ;;  %v1744_v7 = vcombine.high %v3719_v11, %v3718_v16  ;;  %v3720_v3 = vld [vmem:[#allocation70_spill] sm:$0xff] }
  0xd1   : >> { %1322 = vmatprep.subr.bf16.mxu0 %v1740_v18  ;;  %1363 = vmatprep.subr.bf16.mxu1 %v1742_v12  ;;  %v3721_v4 = vmov %v3720_v3  ;;  %v1746_v6 = vcombine.high %v3722_v5, %v3720_v3  ;;  %v3723_v18 = vld [vmem:[#allocation73_spill] sm:$0xff]  ;;  %v3724_v12 = vld [vmem:[#allocation71_spill] sm:$0xff] }
  0xd2   : >> { %v1745_v15 = vcombine.low %v3722_v5, %v3721_v4  ;;  %v1747_v17 = vcombine.low %v3724_v12, %v3723_v18  ;;  %v3731_v5 = vld [vmem:[#allocation76_spill] sm:$0xff] }
  0xd4   : >> { %1323 = vmatpush1.bf16.msra.mxu0 %v1739_v8  ;;  %1364 = vmatpush1.bf16.msra.mxu1 %v1741_v14  ;;  %v1748_v8 = vcombine.high %v3724_v12, %v3723_v18  ;;  %v3725_v14 = vld [vmem:[#allocation74_spill] sm:$0xff] }
  0xd5   : >> { %1324 = vmatprep.subr.bf16.mxu0 %v1744_v7  ;;  %1365 = vmatprep.subr.bf16.mxu1 %v1746_v6  ;;  %v1750_v10 = vcombine.high %v3726_v9, %v3725_v14  ;;  %v1749_v3 = vcombine.low %v3726_v9, %v3725_v14  ;;  %v3727_v7 = vld [vmem:[#allocation77_spill] sm:$0xff]  ;;  %v3729_v6 = vld [vmem:[#allocation75_spill] sm:$0xff]  ;;  %v3737_v14 = vld [vmem:[#allocation80_spill] sm:$0xff] }
  0xd6   : >> { %v3728_v4 = vmov %v3727_v7 }
  0xd7   : >> { %v1751_v16 = vcombine.low %v3729_v6, %v3728_v4  ;;  %v3741_v4 = vld [vmem:[#allocation84_spill] sm:$0xff] }
  0xd8   : >> { %1325 = vmatpush1.bf16.msra.mxu0 %v1743_v13  ;;  %1366 = vmatpush1.bf16.msra.mxu1 %v1745_v15  ;;  %v1752_v13 = vcombine.high %v3729_v6, %v3727_v7  ;;  %v3730_v15 = vld [vmem:[#allocation78_spill] sm:$0xff]  ;;  %v3745_v6 = vld [vmem:[#allocation88_spill] sm:$0xff] }
  0xd9   : >> { %1326 = vmatprep.subr.bf16.mxu0 %v1748_v8  ;;  %1367 = vmatprep.subr.bf16.mxu1 %v1750_v10  ;;  %v1754_v11 = vcombine.high %v3731_v5, %v3730_v15  ;;  %v1753_v19 = vcombine.low %v3731_v5, %v3730_v15  ;;  %v3732_v8 = vld [vmem:[#allocation81_spill] sm:$0xff]  ;;  %v3734_v10 = vld [vmem:[#allocation79_spill] sm:$0xff] }
  0xda   : >> { %v3733_v9 = vmov %v3732_v8  ;;  %v3751_v15 = vld [vmem:[#allocation95_spill] sm:$0xff] }
  0xdb   : >> { %v1755_v7 = vcombine.low %v3734_v10, %v3733_v9 }
  0xdc   : >> { %1327 = vmatpush1.bf16.msra.mxu0 %v1747_v17  ;;  %1368 = vmatpush1.bf16.msra.mxu1 %v1749_v3  ;;  %v1756_v17 = vcombine.high %v3734_v10, %v3732_v8  ;;  %v3735_v3 = vld [vmem:[#allocation82_spill] sm:$0xff] }
  0xdd   : >> { %1328 = vmatprep.subr.bf16.mxu0 %v1752_v13  ;;  %1369 = vmatprep.subr.bf16.mxu1 %v1754_v11  ;;  %v3736_v12 = vmov %v3735_v3  ;;  %v1758_v18 = vcombine.high %v3737_v14, %v3735_v3  ;;  %v3738_v13 = vld [vmem:[#allocation85_spill] sm:$0xff]  ;;  %v3739_v11 = vld [vmem:[#allocation83_spill] sm:$0xff] }
  0xde   : >> { %v1757_v20 = vcombine.low %v3737_v14, %v3736_v12  ;;  %v1759_v8 = vcombine.low %v3739_v11, %v3738_v13 }
  0xe0   : >> { %1329 = vmatpush1.bf16.msra.mxu0 %v1751_v16  ;;  %1370 = vmatpush1.bf16.msra.mxu1 %v1753_v19  ;;  %v1760_v16 = vcombine.high %v3739_v11, %v3738_v13  ;;  %v3740_v19 = vld [vmem:[#allocation86_spill] sm:$0xff]  ;;  %v3746_v11 = vld [vmem:[#allocation93_spill] sm:$0xff]  ;;  %v3747_v13 = vld [vmem:[#allocation91_spill] sm:$0xff] }
  0xe1   : >> { %1330 = vmatprep.subr.bf16.mxu0 %v1756_v17  ;;  %1371 = vmatprep.subr.bf16.mxu1 %v1758_v18  ;;  %v1762_v5 = vcombine.high %v3741_v4, %v3740_v19  ;;  %v1761_v3 = vcombine.low %v3741_v4, %v3740_v19  ;;  %v3742_v17 = vld [vmem:[#allocation89_spill] sm:$0xff]  ;;  %v3743_v18 = vld [vmem:[#allocation87_spill] sm:$0xff]  ;;  %v1768_v14 = vcombine.high %v3747_v13, %v3746_v11  ;;  %v3748_v4 = vld [vmem:[#allocation94_spill] sm:$0xff] }
  0xe2   : >> { %v1763_v10 = vcombine.low %v3743_v18, %v3742_v17 }
  0xe4   : >> { %1331 = vmatpush1.bf16.msra.mxu0 %v1755_v7  ;;  %1372 = vmatpush1.bf16.msra.mxu1 %v1757_v20  ;;  %v1764_v7 = vcombine.high %v3743_v18, %v3742_v17  ;;  %v3744_v20 = vld [vmem:[#allocation90_spill] sm:$0xff] }
  0xe5   : >> { %1332 = vmatprep.subr.bf16.mxu0 %v1760_v16  ;;  %1373 = vmatprep.subr.bf16.mxu1 %v1762_v5  ;;  %v1766_v9 = vcombine.high %v3745_v6, %v3744_v20  ;;  %v1765_v12 = vcombine.low %v3745_v6, %v3744_v20  ;;  %v3749_v16 = vld [vmem:[#allocation92_spill] sm:$0xff]  ;;  %v3750_v6 = vld [vmem:[#allocation97_spill] sm:$0xff]  ;;  %v3752_v18 = vld [vmem:[#allocation98_spill] sm:$0xff] }
  0xe6   : >> { %v1770_v5 = vcombine.high %v3749_v16, %v3748_v4  ;;  %v1772_v17 = vcombine.high %v3751_v15, %v3750_v6  ;;  %v1771_v0 = vcombine.low %v3751_v15, %v3750_v6 }
  0xe8   : >> { %1333 = vmatpush1.bf16.msra.mxu0 %v1759_v8  ;;  %1374 = vmatpush1.bf16.msra.mxu1 %v1761_v3  ;;  %v1767_v8 = vcombine.low %v3747_v13, %v3746_v11  ;;  %v1769_v3 = vcombine.low %v3749_v16, %v3748_v4 }
  0xe9   : >> { %1334 = vmatprep.subr.bf16.mxu0 %v1764_v7  ;;  %1375 = vmatprep.subr.bf16.mxu1 %v1766_v9  ;;  %v3753_v7 = vld [vmem:[#allocation96_spill] sm:$0xff] }
  0xea   : >> { %v3754_v19 = vmov %v3753_v7  ;;  %v1774_v9 = vcombine.high %v3753_v7, %v3752_v18 }
  0xec   : >> { %1335 = vmatpush1.bf16.msra.mxu0 %v1763_v10  ;;  %1376 = vmatpush1.bf16.msra.mxu1 %v1765_v12  ;;  %v1773_v12 = vcombine.low %v3754_v19, %v3752_v18  ;;  %v3755_v10 = vld [vmem:[#allocation99_spill] sm:$0xff] }
  0xed   : >> { %1336 = vmatprep.subr.bf16.mxu0 %v1768_v14  ;;  %1377 = vmatprep.subr.bf16.mxu1 %v1770_v5  ;;  %v3756_v5 = vrot.slane %v3755_v10, %v2712_v2 }
  0xf0   : >> { %1337 = vmatpush1.bf16.msra.mxu0 %v1767_v8  ;;  %1378 = vmatpush1.bf16.msra.mxu1 %v1769_v3  ;;  %v3757_v8 = vrot.slane %v3755_v10, %v2729_v1  ;;  %v3776_v10 = vld [vmem:[#allocation120_spill] sm:$0xff] }
  0xf1   : >> { %1338 = vmatprep.subr.bf16.mxu0 %v1772_v17  ;;  %1379 = vmatprep.subr.bf16.mxu1 %v1774_v9 }
  0xf4   : >> { %1339 = vmatpush1.bf16.msra.mxu0 %v1771_v0  ;;  %1380 = vmatpush1.bf16.msra.mxu1 %v1773_v12  ;;  %v3758_v12 = vld [vmem:[#allocation101_spill] sm:$0xff] }
 0x18a   : >> { %v918_v14 = vpop.f32.mrb[0].mxu0  ;;  %v959_v13 = vpop.f32.mrb[0].mxu1 }
 0x18b   : >> { %v919_v4 = vadd.f32 %v918_v14, %v3756_v5  ;;  %v920_v11 = vpop.f32.mrb[1].mxu0  ;;  %v961_v6 = vpop.f32.mrb[1].mxu1  ;;  %v960_v22 = vadd.f32 %v959_v13, %v3759_v21 }
 0x18c   : >> { %v921_v3 = vadd.f32 %v920_v11, %v3757_v8  ;;  %v922_v7 = vpop.f32.mrb[2].mxu0  ;;  %v963_v18 = vpop.f32.mrb[2].mxu1  ;;  %v962_v19 = vadd.f32 %v961_v6, %v3758_v12  ;;  %v3763_v12 = vld [vmem:[#allocation108_spill] sm:$0xff] }
 0x18d   : >> { %v966_v15 = vsub.f32 0.0, %v919_v4  ;;  %v923_v16 = vpop.f32.mrb[3].mxu0  ;;  %v964_v9 = vpop.f32.mrb[3].mxu1 }
 0x18e   : >> { %v971_v17 = vsub.f32 0.0, %v921_v3  ;;  %v977_v14 = vsub.f32 0.0, %v962_v19  ;;  %v3762_v19 = vld [vmem:[#allocation103_spill] sm:$0xff] }
 0x18f   : >> { %v967_v0 = vmul.f32 1.442695, %v966_v15 }
 0x190   : >> { %v972_v20 = vmul.f32 1.442695, %v971_v17  ;;  %v978_v5 = vmul.f32 1.442695, %v977_v14  ;;  %v3760_v17 = vld [vmem:[#allocation123_spill] sm:$0xff] }
 0x191   : >> { %1885 = vpow2.f32 %v967_v0  ;;  %v3764_v14 = vld [vmem:[#allocation107_spill] sm:$0xff] }
 0x192   : >> { %1887 = vpow2.f32 %v972_v20 }
 0x193   : >> { %1889 = vpow2.f32 %v978_v5  ;;  %v1778_v5 = vcombine.high %v3764_v14, %v3763_v12 }
 0x194   : >> { %1891 = vtanh.f32 %v960_v22  ;;  %v3761_v22 = vld [vmem:[#allocation104_spill] sm:$0xff] }
 0x195   : >> { %v1776_v9 = vcombine.high %v3762_v19, %v3761_v22  ;;  %v1775_v0 = vcombine.low %v3762_v19, %v3761_v22 }
 0x197   : >> { %1492 = vmatprep.subr.bf16.mxu0 %v1776_v9 }
 0x19b   : >> { %v1886_v23 = vpop.eup %1885 }
 0x19c   : >> { %v1888_v11 = vpop.eup %1887  ;;  %v969_v8 = vadd.f32 1.0, %v1886_v23 }
 0x19d   : >> { %v974_v7 = vadd.f32 1.0, %v1888_v11  ;;  %v1890_v4 = vpop.eup %1889  ;;  %v1777_v11 = vcombine.low %v3764_v14, %v3763_v12 }
 0x19e   : >> { %1893 = vrcp.f32 %v969_v8  ;;  %v1892_v18 = vpop.eup %1891  ;;  %v980_v16 = vadd.f32 1.0, %v1890_v4 }
 0x19f   : >> { %1895 = vrcp.f32 %v974_v7  ;;  %v3765_v7 = vld [vmem:[#allocation110_spill] sm:$0xff] }
 0x1a0   : >> { %1897 = vrcp.f32 %v980_v16  ;;  %v3766_v4 = vmov %v3765_v7 }
 0x1a8   : >> { %v1894_v15 = vpop.eup %1893 }
 0x1a9   : >> { %v1896_v6 = vpop.eup %1895  ;;  %v983_v3 = vmul.f32 %v1894_v15, %v1892_v18  ;;  %v3767_v18 = vld [vmem:[#allocation109_spill] sm:$0xff] }
 0x1aa   : >> { %v982_v20 = vmul.f32 %v3760_v17, %v1896_v6  ;;  %v1898_v21 = vpop.eup %1897  ;;  %v1780_v15 = vcombine.high %v3767_v18, %v3765_v7  ;;  %v1779_v16 = vcombine.low %v3767_v18, %v3766_v4  ;;  %v3768_v6 = vld [vmem:[#allocation112_spill] sm:$0xff]  ;;  %v3769_v17 = vld [vmem:[#allocation111_spill] sm:$0xff]  ;;  %v3775_v4 = vld [vmem:[#allocation117_spill] sm:$0xff] }
 0x1ac   : >> { %v3190_v8 = vadd.f32 %v983_v3, %v982_v20   ;;  %v1782_v20 = vcombine.high %v3769_v17, %v3768_v6 }
 0x1ae   : >> { %1899 = vtanh.f32 %v3190_v8 }
 0x1b8   : >> { %v1900_v13 = vpop.eup %1899 }
 0x1b9   : >> { %v986_v23 = vmul.f32 %v1900_v13, %v1898_v21  ;;  %v1781_v21 = vcombine.low %v3769_v17, %v3768_v6  ;;  %v3770_v13 = vld [vmem:[#allocation114_spill] sm:$0xff] }
 0x1bb   : >> { %v3193_v3 = vpack.c.bf16 %v986_v23, %v986_v23   ;;  %v3771_v23 = vld [vmem:[#allocation113_spill] sm:$0xff] }
 0x1bc   : >> { %v1784_v9 = vcombine.high %v3771_v23, %v3770_v13 }
 0x1bd   : >> { %1341 = vmatmul.mubr.bf16.vlgmr.msra.gmra.mrb[4].mxu0 %v3193_v3  ;;  %1382 = vmatmul.mubr.bf16.vlgmr.msra.gmra.mrb[4].mxu1 %v3193_v3 }
 0x1be   : >> { %1493 = vmatpush1.bf16.msra.mxu0 %v1775_v0  ;;  %v1783_v0 = vcombine.low %v3771_v23, %v3770_v13 }
 0x1bf   : >> { %1494 = vmatprep.subr.bf16.mxu0 %v1778_v5  ;;  %v3772_v5 = vld [vmem:[#allocation116_spill] sm:$0xff] }
 0x1c2   : >> { %1495 = vmatpush1.bf16.msra.mxu0 %v1777_v11  ;;  %v3773_v11 = vld [vmem:[#allocation115_spill] sm:$0xff] }
 0x1c3   : >> { %1496 = vmatprep.subr.bf16.mxu0 %v1780_v15  ;;  %v1786_v7 = vcombine.high %v3773_v11, %v3772_v5  ;;  %v1785_v15 = vcombine.low %v3773_v11, %v3772_v5  ;;  %v3778_v11 = vld [vmem:[#allocation102_spill] sm:$0xff] }
 0x1c4   : >> { %v3779_v13 = vrot.slane %v3778_v11, %v2712_v2 }
 0x1c6   : >> { %1497 = vmatpush1.bf16.msra.mxu0 %v1779_v16  ;;  %v3774_v16 = vld [vmem:[#allocation118_spill] sm:$0xff] }
 0x1c7   : >> { %1498 = vmatprep.subr.bf16.mxu0 %v1782_v20  ;;  %v1788_v6 = vcombine.high %v3775_v4, %v3774_v16  ;;  %v2021_v20 = vmov 0  }
 0x1c8   : >> { %1524 = vmatprep.mubr.bf16.mxu0 %v2021_v20 }
 0x1ca   : >> { %1499 = vmatpush1.bf16.msra.mxu0 %v1781_v21  ;;  %v1787_v21 = vcombine.low %v3775_v4, %v3774_v16 }
 0x1cb   : >> { %1500 = vmatprep.subr.bf16.mxu0 %v1784_v9  ;;  %v3777_v9 = vld [vmem:[#allocation119_spill] sm:$0xff] }
 0x1cc   : >> { %v1790_v12 = vcombine.high %v3777_v9, %v3776_v10 }
 0x1ce   : >> { %1501 = vmatpush1.bf16.msra.mxu0 %v1783_v0  ;;  %v1789_v0 = vcombine.low %v3777_v9, %v3776_v10  ;;  %v3781_v10 = vld [vmem:[#allocation106_spill] sm:$0xff] }
 0x1cf   : >> { %1502 = vmatprep.subr.bf16.mxu0 %v1786_v7 }
 0x1d2   : >> { %1503 = vmatpush1.bf16.msra.mxu0 %v1785_v15 }
 0x1d3   : >> { %1504 = vmatprep.subr.bf16.mxu0 %v1788_v6  ;;  %v3780_v6 = vrot.slane %v3778_v11, %v2729_v1 }
 0x1d6   : >> { %1505 = vmatpush1.bf16.msra.mxu0 %v1787_v21 }
 0x1d7   : >> { %1506 = vmatprep.subr.bf16.mxu0 %v1790_v12 }
 0x1da   : >> { %1507 = vmatpush1.bf16.msra.mxu0 %v1789_v0 }
 0x290   : >> { %v1342_v7 = vpop.f32.mrb[4].mxu0  ;;  %v1383_v5 = vpop.f32.mrb[4].mxu1 }
 0x291   : >> { %v1343_v20 = vadd.f32 %v1342_v7, %v3779_v13  ;;  %v1344_v15 = vpop.f32.mrb[5].mxu0  ;;  %v1385_v14 = vpop.f32.mrb[5].mxu1  ;;  %v3782_v7 = vld [vmem:[#allocation105_spill] sm:$0xff] }
 0x292   : >> { %v1345_v4 = vadd.f32 %v1344_v15, %v3780_v6  ;;  %v1346_v16 = vpop.f32.mrb[6].mxu0  ;;  %v1387_v17 = vpop.f32.mrb[6].mxu1  ;;  %v1386_v22 = vadd.f32 %v1385_v14, %v3781_v10  ;;  %v1384_v24 = vadd.f32 %v1383_v5, %v3782_v7 }
 0x293   : >> { %v1390_v21 = vsub.f32 0.0, %v1343_v20  ;;  %v1347_v18 = vpop.f32.mrb[7].mxu0  ;;  %v1388_v19 = vpop.f32.mrb[7].mxu1 }
 0x294   : >> { %v1395_v9 = vsub.f32 0.0, %v1345_v4  ;;  %v1401_v23 = vsub.f32 0.0, %v1386_v22  ;;  %v3783_v22 = vld [vmem:[#allocation122_spill] sm:$0xff] }
 0x295   : >> { %v1391_v12 = vmul.f32 1.442695, %v1390_v21 }
 0x296   : >> { %v1396_v0 = vmul.f32 1.442695, %v1395_v9  ;;  %v1402_v13 = vmul.f32 1.442695, %v1401_v23 }
 0x297   : >> { %1901 = vpow2.f32 %v1391_v12 }
 0x298   : >> { %1903 = vpow2.f32 %v1396_v0 }
 0x299   : >> { %1905 = vpow2.f32 %v1402_v13 }
 0x29a   : >> { %1907 = vtanh.f32 %v1384_v24 }
 0x2a1   : >> { %v1902_v25 = vpop.eup %1901 }
 0x2a2   : >> { %v1904_v26 = vpop.eup %1903  ;;  %v1393_v11 = vadd.f32 1.0, %v1902_v25 }
 0x2a3   : >> { %v1398_v17 = vadd.f32 1.0, %v1904_v26  ;;  %v1906_v19 = vpop.eup %1905  ;;  %v3784_v26 = vld [vmem:[#allocation121_spill] sm:$0xff] }
 0x2a4   : >> { %1909 = vrcp.f32 %v1393_v11  ;;  %v1908_v4 = vpop.eup %1907  ;;  %v1404_v16 = vadd.f32 1.0, %v1906_v19  ;;  %v3785_v11 = vrot.slane %v3784_v26, %v2712_v2  ;;  %v3786_v6 = vrot.slane %v3784_v26, %v2729_v1 }
 0x2a5   : >> { %1911 = vrcp.f32 %v1398_v17 }
 0x2a6   : >> { %1913 = vrcp.f32 %v1404_v16 }
 0x2ae   : >> { %v1910_v18 = vpop.eup %1909 }
 0x2af   : >> { %v1912_v10 = vpop.eup %1911  ;;  %v1407_v14 = vmul.f32 %v1910_v18, %v1908_v4 }
 0x2b0   : >> { %v1406_v23 = vmul.f32 %v3783_v22, %v1912_v10  ;;  %v1914_v5 = vpop.eup %1913 }
 0x2b2   : >> { %v1408_v7 = vadd.f32 %v1407_v14, %v1406_v23  }
 0x2b4   : >> { %1915 = vtanh.f32 %v1408_v7 }
 0x2be   : >> { %v1916_v25 = vpop.eup %1915 }
 0x2bf   : >> { %v1410_v9 = vmul.f32 %v1916_v25, %v1914_v5 }
 0x2c1   : >> { %v1411_v0 = vpack.c.bf16 %v1410_v9, %v1410_v9  }
 0x2c3   : >> { %1525 = vmatmul.mubr.bf16.vlgmr.msra.gmra.mrb[8].mxu0 %v1411_v0 }
 0x394   : > { %555 = sbr.rel (!%p553_p13) target bundleno = 111 (0x6f), region = 138 }
 0x396   : >> { %v1526_v24 = vpop.f32.mrb[8].mxu0 }
 0x397   : >> { %v1527_v20 = vadd.f32 %v1526_v24, %v3785_v11  ;;  %v1528_v15 = vpop.f32.mrb[9].mxu0 }
 0x398   : >> { %v1529_v21 = vadd.f32 %v1528_v15, %v3786_v6  ;;  %v1530_v12 = vpop.f32.mrb[10].mxu0 }
 0x399   : >> { %1536 = vst [vmem:[%s1535_s22] sm:$0xff] %v1527_v20  ;;  %v1531_v13 = vpop.f32.mrb[11].mxu0 }
 0x39a   : >> { %1537 = vst [vmem:[%s1535_s22 + $0x8] sm:$0xff] %v1529_v21 }
 0x39b   : > { %1930 = shalt.err (!%p1927_p7)
}
 0x39c   : > { %s1931_s17 = scalar_lea.hbm %s3264_s9, 2304  ;;  %s1935_s22 = scalar_lea.hbm %s3318_s7, 4608 }
 0x39d   : > { %p1932_p10 = scmp.ne.s32.totalorder %s3264_s9, %s1931_s17  ;;  %p1936_p13 = scmp.lt.u32.totalorder %s3264_s9, %s3318_s7 }
 0x39e   : > { %p1937_p0 = scmp.lt.u32.totalorder %s1935_s22, %s1931_s17  ;;  %p1939_p2 = scmp.lt.u32.totalorder %s1931_s17, %s3264_s9 }
 0x39f   : > { %p1933_p11 = pnand %p1932_p10, %p2104_p6 }
 0x3a0   : > { %p1938_p1 = por %p1937_p0, %p1936_p13 }
 0x3a1   : > { %p1934_p12 = pneg %p1933_p11 }
 0x3a2   : > { %p1940_p3 = por %p1939_p2, %p1938_p1 }
 0x3a4   : > { %p1941_p4 = pnand %p1940_p3, %p1934_p12 }
 0x3a6   : > { %1944 = shalt.err (!%p1941_p4)
}
 0x3a7   : > { %s2023_s8 = smov 256   ;;  %s2024_s18 = smov 512  }
 0x3a8   : > { %s2025_s16 = smov 16  }
 0x3a9   : > { %1802 = dma.vmem_to_hbm [thread:$0]  (%p2104_p6), %s3267_s14, 2304, %s3264_s9, %s1539_s15, %s2023_s8, %s2024_s18, %s2025_s16  }
 0x3aa PF: > { %s1567_s13 = sand.u32 1, %s1987_s24   ;;  %p1805_p5 = pnand %p1643_p9, %p2108_p8 }
 0x3ab   : > { %s1568_s28 = scalar_lea.sflag [#allocation4], %s1567_s13 }
 0x3ac   : > { %1982 = dma.done.wait (!%p1805_p5), %s1568_s28, 2304  }
 0x3ad   : > { %1984 = vsyncadd (!%p1805_p5), %s1568_s28, 4294964992  ;;  %p17_p7 = scmp.ge.s32.totalorder %s2089_s30, 4   ;;  %s3787_s24 = smov %s1991_s25 }
 0x3ae   : > { %s3788_s25 = smov %s1995_s26  ;;  %s3789_s26 = smov %s2102_s10 }
 0x3af   : > { %s3790_s27 = smov %s2089_s30  ;;  %19 = sbr.rel (!%p17_p7) target bundleno = 3 (0x3), region = 149 }
 0x3b6   :  { %1573 = vsyncpa [#allocation4], 1 }
 0x3b7   :  { %1575 = vsyncpa [#allocation4 + $0x1], 1 }

</bundles_post_ra>
